<compile_context>
chip_gen: v7x
topology: tpu7x:2x2x1
jax: 0.10.0
libtpu: 0.0.40
codegen_flags: <defaults>
</compile_context>

<pallas_src>
import numpy as np
import jax
import jax.numpy as jnp
from jax.experimental import pallas as pl
from jax.experimental.pallas import tpu as pltpu

LANE = 128


def _round_up(x, m):
    return (x + m - 1) // m * m


# ----------------------------- Pallas kernels ------------------------------

def conv_relu_pool_kernel(x0_ref, x1_ref, x2_ref, x3_ref, w_ref, b_ref, o_ref):
    """Fused conv-as-matmul + 2x2 max-pool + bias + ReLU for one M tile.

    x{0..3}_ref : (tm, K) bf16  im2col patches, one per 2x2 pool tap
    w_ref       : (K, 128) bf16 conv weights (Cout zero-padded to 128 lanes)
    b_ref       : (1, 128) f32  conv bias (zero-padded)
    o_ref       : (tm, 128) bf16 pooled output tile (lane-dense)
    """
    w = w_ref[...]
    y = jnp.dot(x0_ref[...], w, preferred_element_type=jnp.float32)
    y = jnp.maximum(y, jnp.dot(x1_ref[...], w, preferred_element_type=jnp.float32))
    y = jnp.maximum(y, jnp.dot(x2_ref[...], w, preferred_element_type=jnp.float32))
    y = jnp.maximum(y, jnp.dot(x3_ref[...], w, preferred_element_type=jnp.float32))
    # bias + ReLU once, AFTER pooling (relu(x + b) is monotone in x).
    o_ref[...] = jnp.maximum(y + b_ref[...], 0.0).astype(o_ref.dtype)


def linear_kernel(x_ref, w_ref, b_ref, o_ref):
    """x_ref: (Bp, K) bf16; w_ref: (K, 128) bf16; b_ref: (1, 128) f32; o_ref: (Bp, 128) f32."""
    y = jnp.dot(x_ref[...], w_ref[...], preferred_element_type=jnp.float32)
    o_ref[...] = (y + b_ref[...]).astype(o_ref.dtype)


# ------------------------------- JAX glue -----------------------------------

def _pool_tap_patches(x_nhwc, ksize=5, pad=2):
    """Return 4 bf16 patch matrices of shape (B*Ho*Wo, Cin*ksize*ksize), one per
    2x2 pool tap (stride-2 patch extraction; no stack, no padding).

    Rows ordered (b, ho, wo); columns ordered channel-major (ci, kh, kw) to match
    PyTorch's weight.reshape(Cout, Cin*KH*KW)."""
    B, H, W, C = x_nhwc.shape
    Ho, Wo = H // 2, W // 2
    K = C * ksize * ksize
    x = x_nhwc.astype(jnp.bfloat16)          # bf16 before the patch expansion
    taps = []
    for dh in (0, 1):
        for dw in (0, 1):
            # conv output position (2*ho+dh, 2*wo+dw) with SAME-style padding `pad`.
            p = jax.lax.conv_general_dilated_patches(
                x, filter_shape=(ksize, ksize), window_strides=(2, 2),
                padding=((pad - dh, dh + (ksize - pad - 2)),
                         (pad - dw, dw + (ksize - pad - 2))),
                dimension_numbers=("NHWC", "HWIO", "NHWC"))
            taps.append(p.reshape(B * Ho * Wo, K))
    return taps                               # 4 x (M, K) bf16


def conv_relu_pool(x_nhwc, w_mat, b_row, cout, tm_target=1024):
    """x_nhwc: (B,H,W,Cin); w_mat: (K,128) bf16; b_row: (1,128) f32.
    Returns (B, H//2, W//2, cout) bf16."""
    B, H, W, _ = x_nhwc.shape
    Ho, Wo = H // 2, W // 2
    K, Np = w_mat.shape

    taps = _pool_tap_patches(x_nhwc)          # 4 x (M, K) bf16
    M = B * Ho * Wo

    # >=2 grid steps (v7x megacore sharding of the "parallel" axis); tm multiple
    # of 16 (bf16 sublane tile); no M padding -> partial final block.
    grid_m = max(2, pl.cdiv(M, tm_target))
    tm = _round_up(pl.cdiv(M, grid_m), 16)
    grid_m = pl.cdiv(M, tm)                   # ensure no fully out-of-bounds block

    out = pl.pallas_call(
        conv_relu_pool_kernel,
        out_shape=jax.ShapeDtypeStruct((M, Np), jnp.bfloat16),
        grid_spec=pltpu.PrefetchScalarGridSpec(
            num_scalar_prefetch=0,
            grid=(grid_m,),
            in_specs=[pl.BlockSpec((tm, K), lambda i: (i, 0))] * 4 + [
                pl.BlockSpec((K, Np), lambda i: (0, 0)),
                pl.BlockSpec((1, Np), lambda i: (0, 0)),
            ],
            out_specs=pl.BlockSpec((tm, Np), lambda i: (i, 0)),
        ),
        compiler_params=pltpu.CompilerParams(
            dimension_semantics=("parallel",),
            vmem_limit_bytes=32 * 1024 * 1024),
    )(*taps, w_mat, b_row)

    return out[:, :cout].reshape(B, Ho, Wo, cout)     # stays bf16


def linear(feat, w_mat, b_row, nout):
    """feat: (B, K) bf16; w_mat: (K, 128) bf16; b_row: (1, 128) f32 -> (B, nout) f32."""
    B, K = feat.shape
    _, Np = w_mat.shape
    Bp = _round_up(B, 16)                     # bf16 sublane tile
    x = jnp.pad(feat.astype(jnp.bfloat16), ((0, Bp - B), (0, 0)))
    out = pl.pallas_call(
        linear_kernel,
        out_shape=jax.ShapeDtypeStruct((Bp, Np), jnp.float32),
        in_specs=[pl.BlockSpec(memory_space=pltpu.MemorySpace.VMEM)] * 3,
        out_specs=pl.BlockSpec(memory_space=pltpu.MemorySpace.VMEM),
        compiler_params=pltpu.CompilerParams(
            vmem_limit_bytes=32 * 1024 * 1024),
    )(x, w_mat, b_row)
    return out[:B, :nout]


def _prep_conv_params(w, b):
    """PyTorch (Cout,Cin,KH,KW)/(Cout,) -> ((K,128) bf16 matmul matrix, (1,128) f32 bias).
    K is left unpadded; only Cout is padded to 128 lanes."""
    cout, cin, kh, kw = w.shape
    k = cin * kh * kw
    wm = w.reshape(cout, k).T                                # (K, Cout), cols (ci,kh,kw)
    wm = jnp.pad(wm.astype(jnp.bfloat16), ((0, 0), (0, LANE - cout)))
    br = jnp.pad(b.astype(jnp.float32), (0, LANE - cout)).reshape(1, LANE)
    return wm, br


def _prep_linear_params(wl, bl, cin, hh, ww):
    """PyTorch Linear weight (N, Cin*H*W) flattened in (c,h,w) order -> NHWC-row-ordered
    (K, 128) bf16 matrix so the features can stay in NHWC flatten order (no transpose)."""
    nout, k = wl.shape
    wm = wl.reshape(nout, cin, hh, ww).transpose(2, 3, 1, 0).reshape(k, nout)
    wm = jnp.pad(wm.astype(jnp.bfloat16), ((0, 0), (0, LANE - nout)))
    br = jnp.pad(bl.astype(jnp.float32), (0, LANE - nout)).reshape(1, LANE)
    return wm, br


@jax.jit
def cnn_forward(x_nchw, w1, b1, w2, b2, wl, bl):
    """Forward pass matching the PyTorch CNN.forward.

    x_nchw: (B, 1, 28, 28); PyTorch layouts: w1 (16,1,5,5), b1 (16,),
    w2 (32,16,5,5), b2 (32,), wl (10, 32*7*7), bl (10,)."""
    B = x_nchw.shape[0]
    x = jnp.transpose(x_nchw, (0, 2, 3, 1))                  # NCHW -> NHWC (C=1)

    w1m, b1r = _prep_conv_params(w1, b1)
    y1 = conv_relu_pool(x, w1m, b1r, cout=w1.shape[0])       # (B,14,14,16) bf16

    w2m, b2r = _prep_conv_params(w2, b2)
    y2 = conv_relu_pool(y1, w2m, b2r, cout=w2.shape[0])      # (B,7,7,32) bf16

    # NHWC flatten; the Linear weight was permuted to NHWC order at trace time.
    feat = y2.reshape(B, -1)                                 # (B, 7*7*32) bf16
    wlm, blr = _prep_linear_params(wl, bl, cin=w2.shape[0],
                                   hh=y2.shape[1], ww=y2.shape[2])
    return linear(feat, wlm, blr, nout=wl.shape[0])          # (B, 10) f32


# ---------------------------- pure-JAX reference ----------------------------

def reference_forward(x, w1, b1, w2, b2, wl, bl):
    def block(x, w, b):
        y = jax.lax.conv_general_dilated(
            x, w, window_strides=(1, 1), padding=((2, 2), (2, 2)),
            dimension_numbers=("NCHW", "OIHW", "NCHW"))
        y = jax.nn.relu(y + b[None, :, None, None])
        return jax.lax.reduce_window(y, -jnp.inf, jax.lax.max,
                                     (1, 1, 2, 2), (1, 1, 2, 2), "VALID")
    y = block(x, w1, b1)
    y = block(y, w2, b2)
    feat = y.reshape(y.shape[0], -1)
    return feat @ wl.T + bl


# --------------------------------- main --------------------------------------

if __name__ == "__main__":
    key = jax.random.PRNGKey(0)
    ks = jax.random.split(key, 7)

    # Small, deterministic synthetic inputs & params (module implies 28x28 input).
    x = jax.random.normal(ks[0], (2, 1, 28, 28), jnp.float32)
    w1 = jax.random.normal(ks[1], (16, 1, 5, 5), jnp.float32) * 0.10
    b1 = jax.random.normal(ks[2], (16,), jnp.float32) * 0.10
    w2 = jax.random.normal(ks[3], (32, 16, 5, 5), jnp.float32) * 0.05
    b2 = jax.random.normal(ks[4], (32,), jnp.float32) * 0.05
    wl = jax.random.normal(ks[5], (10, 32 * 7 * 7), jnp.float32) * 0.02
    bl = jax.random.normal(ks[6], (10,), jnp.float32) * 0.02

    out = cnn_forward(x, w1, b1, w2, b2, wl, bl)
    out = jax.block_until_ready(out)
    assert out.shape == (2, 10)

    ref = reference_forward(x, w1, b1, w2, b2, wl, bl)
    # bf16 matmul operands / bf16 conv activations (f32 accumulate) vs f32 reference.
    np.testing.assert_allclose(np.asarray(out), np.asarray(ref),
                               rtol=5e-2, atol=5e-2)
    print("KERNEL_OK")
</pallas_src>

<mosaic_0001>
module attributes {stable_mosaic.version = 11 : i64} {
  func.func @conv_relu_pool_kernel(%arg0: i32, %arg1: memref<208x25xbf16, #tpu.memory_space<vmem>>, %arg2: memref<208x25xbf16, #tpu.memory_space<vmem>>, %arg3: memref<208x25xbf16, #tpu.memory_space<vmem>>, %arg4: memref<208x25xbf16, #tpu.memory_space<vmem>>, %arg5: memref<25x128xbf16, #tpu.memory_space<vmem>>, %arg6: memref<1x128xf32, #tpu.memory_space<vmem>>, %arg7: memref<208x128xbf16, #tpu.memory_space<vmem>>) attributes {dimension_semantics = [#tpu.dimension_semantics<parallel>], iteration_bounds = array<i64: 2>, scalar_prefetch = 0 : i64, scratch_operands = 0 : i64, tpu.core_type = #tpu.core_type<tc>, window_params = [{transform_indices = @transform_0, window_bounds = array<i64: 208, 25>}, {transform_indices = @transform_1, window_bounds = array<i64: 208, 25>}, {transform_indices = @transform_2, window_bounds = array<i64: 208, 25>}, {transform_indices = @transform_3, window_bounds = array<i64: 208, 25>}, {pipeline_mode = #tpu.pipeline_mode<synchronous>, transform_indices = @transform_4, window_bounds = array<i64: 25, 128>}, {pipeline_mode = #tpu.pipeline_mode<synchronous>, transform_indices = @transform_5, window_bounds = array<i64: 1, 128>}, {transform_indices = @transform_6, window_bounds = array<i64: 208, 128>}]} {
    %c0 = arith.constant 0 : index
    %c0_0 = arith.constant 0 : index
    %0 = vector.load %arg5[%c0, %c0_0] : memref<25x128xbf16, #tpu.memory_space<vmem>>, vector<25x128xbf16>
    %c0_1 = arith.constant 0 : index
    %c0_2 = arith.constant 0 : index
    %1 = vector.load %arg1[%c0_1, %c0_2] : memref<208x25xbf16, #tpu.memory_space<vmem>>, vector<208x25xbf16>
    %cst = arith.constant dense<0.000000e+00> : vector<208x128xf32>
    %2 = tpu.matmul %1, %0, %cst {dimension_numbers = #tpu.dot_dimension_numbers<[1], [0], [0], [1], [0, 0, 1, 1], [], []>} : vector<208x25xbf16>, vector<25x128xbf16>, vector<208x128xf32> -> vector<208x128xf32>
    %c0_3 = arith.constant 0 : index
    %c0_4 = arith.constant 0 : index
    %3 = vector.load %arg2[%c0_3, %c0_4] : memref<208x25xbf16, #tpu.memory_space<vmem>>, vector<208x25xbf16>
    %cst_5 = arith.constant dense<0.000000e+00> : vector<208x128xf32>
    %4 = tpu.matmul %3, %0, %cst_5 {dimension_numbers = #tpu.dot_dimension_numbers<[1], [0], [0], [1], [0, 0, 1, 1], [], []>} : vector<208x25xbf16>, vector<25x128xbf16>, vector<208x128xf32> -> vector<208x128xf32>
    %5 = arith.maximumf %2, %4 : vector<208x128xf32>
    %c0_6 = arith.constant 0 : index
    %c0_7 = arith.constant 0 : index
    %6 = vector.load %arg3[%c0_6, %c0_7] : memref<208x25xbf16, #tpu.memory_space<vmem>>, vector<208x25xbf16>
    %cst_8 = arith.constant dense<0.000000e+00> : vector<208x128xf32>
    %7 = tpu.matmul %6, %0, %cst_8 {dimension_numbers = #tpu.dot_dimension_numbers<[1], [0], [0], [1], [0, 0, 1, 1], [], []>} : vector<208x25xbf16>, vector<25x128xbf16>, vector<208x128xf32> -> vector<208x128xf32>
    %8 = arith.maximumf %5, %7 : vector<208x128xf32>
    %c0_9 = arith.constant 0 : index
    %c0_10 = arith.constant 0 : index
    %9 = vector.load %arg4[%c0_9, %c0_10] : memref<208x25xbf16, #tpu.memory_space<vmem>>, vector<208x25xbf16>
    %cst_11 = arith.constant dense<0.000000e+00> : vector<208x128xf32>
    %10 = tpu.matmul %9, %0, %cst_11 {dimension_numbers = #tpu.dot_dimension_numbers<[1], [0], [0], [1], [0, 0, 1, 1], [], []>} : vector<208x25xbf16>, vector<25x128xbf16>, vector<208x128xf32> -> vector<208x128xf32>
    %11 = arith.maximumf %8, %10 : vector<208x128xf32>
    %c0_12 = arith.constant 0 : index
    %c0_13 = arith.constant 0 : index
    %12 = vector.load %arg6[%c0_12, %c0_13] : memref<1x128xf32, #tpu.memory_space<vmem>>, vector<1x128xf32>
    %13 = vector.broadcast %12 : vector<1x128xf32> to vector<208x128xf32>
    %14 = arith.addf %11, %13 : vector<208x128xf32>
    %cst_14 = arith.constant 0.000000e+00 : f32
    %15 = vector.broadcast %cst_14 : f32 to vector<208x128xf32>
    %16 = arith.maximumf %14, %15 : vector<208x128xf32>
    %17 = arith.truncf %16 : vector<208x128xf32> to vector<208x128xbf16>
    %c0_15 = arith.constant 0 : index
    %c0_16 = arith.constant 0 : index
    %18 = vector.load %arg7[%c0_15, %c0_16] : memref<208x128xbf16, #tpu.memory_space<vmem>>, vector<208x128xbf16>
    tpu.vector_store %arg7[%c0_15, %c0_16], %17 {strides = array<i32>} : memref<208x128xbf16, #tpu.memory_space<vmem>>, vector<208x128xbf16>,
    return
  }
  func.func @transform_0(%arg0: i32) -> (i32, i32) {
    %c0_i32 = arith.constant 0 : i32
    %c0_i32_0 = arith.constant 0 : i32
    return %arg0, %c0_i32 : i32, i32
  }
  func.func @transform_1(%arg0: i32) -> (i32, i32) {
    %c0_i32 = arith.constant 0 : i32
    %c0_i32_0 = arith.constant 0 : i32
    return %arg0, %c0_i32 : i32, i32
  }
  func.func @transform_2(%arg0: i32) -> (i32, i32) {
    %c0_i32 = arith.constant 0 : i32
    %c0_i32_0 = arith.constant 0 : i32
    return %arg0, %c0_i32 : i32, i32
  }
  func.func @transform_3(%arg0: i32) -> (i32, i32) {
    %c0_i32 = arith.constant 0 : i32
    %c0_i32_0 = arith.constant 0 : i32
    return %arg0, %c0_i32 : i32, i32
  }
  func.func @transform_4(%arg0: i32) -> (i32, i32) {
    %c0_i32 = arith.constant 0 : i32
    %c0_i32_0 = arith.constant 0 : i32
    %c0_i32_1 = arith.constant 0 : i32
    return %c0_i32, %c0_i32_0 : i32, i32
  }
  func.func @transform_5(%arg0: i32) -> (i32, i32) {
    %c0_i32 = arith.constant 0 : i32
    %c0_i32_0 = arith.constant 0 : i32
    %c0_i32_1 = arith.constant 0 : i32
    return %c0_i32, %c0_i32_0 : i32, i32
  }
  func.func @transform_6(%arg0: i32) -> (i32, i32) {
    %c0_i32 = arith.constant 0 : i32
    %c0_i32_0 = arith.constant 0 : i32
    return %arg0, %c0_i32 : i32, i32
  }
}

module attributes {stable_mosaic.version = 11 : i64} {
  func.func @conv_relu_pool_kernel(%arg0: i32, %arg1: memref<64x400xbf16, #tpu.memory_space<vmem>>, %arg2: memref<64x400xbf16, #tpu.memory_space<vmem>>, %arg3: memref<64x400xbf16, #tpu.memory_space<vmem>>, %arg4: memref<64x400xbf16, #tpu.memory_space<vmem>>, %arg5: memref<400x128xbf16, #tpu.memory_space<vmem>>, %arg6: memref<1x128xf32, #tpu.memory_space<vmem>>, %arg7: memref<64x128xbf16, #tpu.memory_space<vmem>>) attributes {dimension_semantics = [#tpu.dimension_semantics<parallel>], iteration_bounds = array<i64: 2>, scalar_prefetch = 0 : i64, scratch_operands = 0 : i64, tpu.core_type = #tpu.core_type<tc>, window_params = [{transform_indices = @transform_0, window_bounds = array<i64: 64, 400>}, {transform_indices = @transform_1, window_bounds = array<i64: 64, 400>}, {transform_indices = @transform_2, window_bounds = array<i64: 64, 400>}, {transform_indices = @transform_3, window_bounds = array<i64: 64, 400>}, {pipeline_mode = #tpu.pipeline_mode<synchronous>, transform_indices = @transform_4, window_bounds = array<i64: 400, 128>}, {pipeline_mode = #tpu.pipeline_mode<synchronous>, transform_indices = @transform_5, window_bounds = array<i64: 1, 128>}, {transform_indices = @transform_6, window_bounds = array<i64: 64, 128>}]} {
    %c0 = arith.constant 0 : index
    %c0_0 = arith.constant 0 : index
    %0 = vector.load %arg5[%c0, %c0_0] : memref<400x128xbf16, #tpu.memory_space<vmem>>, vector<400x128xbf16>
    %c0_1 = arith.constant 0 : index
    %c0_2 = arith.constant 0 : index
    %1 = vector.load %arg1[%c0_1, %c0_2] : memref<64x400xbf16, #tpu.memory_space<vmem>>, vector<64x400xbf16>
    %cst = arith.constant dense<0.000000e+00> : vector<64x128xf32>
    %2 = tpu.matmul %1, %0, %cst {dimension_numbers = #tpu.dot_dimension_numbers<[1], [0], [0], [1], [0, 0, 1, 1], [], []>} : vector<64x400xbf16>, vector<400x128xbf16>, vector<64x128xf32> -> vector<64x128xf32>
    %c0_3 = arith.constant 0 : index
    %c0_4 = arith.constant 0 : index
    %3 = vector.load %arg2[%c0_3, %c0_4] : memref<64x400xbf16, #tpu.memory_space<vmem>>, vector<64x400xbf16>
    %cst_5 = arith.constant dense<0.000000e+00> : vector<64x128xf32>
    %4 = tpu.matmul %3, %0, %cst_5 {dimension_numbers = #tpu.dot_dimension_numbers<[1], [0], [0], [1], [0, 0, 1, 1], [], []>} : vector<64x400xbf16>, vector<400x128xbf16>, vector<64x128xf32> -> vector<64x128xf32>
    %5 = arith.maximumf %2, %4 : vector<64x128xf32>
    %c0_6 = arith.constant 0 : index
    %c0_7 = arith.constant 0 : index
    %6 = vector.load %arg3[%c0_6, %c0_7] : memref<64x400xbf16, #tpu.memory_space<vmem>>, vector<64x400xbf16>
    %cst_8 = arith.constant dense<0.000000e+00> : vector<64x128xf32>
    %7 = tpu.matmul %6, %0, %cst_8 {dimension_numbers = #tpu.dot_dimension_numbers<[1], [0], [0], [1], [0, 0, 1, 1], [], []>} : vector<64x400xbf16>, vector<400x128xbf16>, vector<64x128xf32> -> vector<64x128xf32>
    %8 = arith.maximumf %5, %7 : vector<64x128xf32>
    %c0_9 = arith.constant 0 : index
    %c0_10 = arith.constant 0 : index
    %9 = vector.load %arg4[%c0_9, %c0_10] : memref<64x400xbf16, #tpu.memory_space<vmem>>, vector<64x400xbf16>
    %cst_11 = arith.constant dense<0.000000e+00> : vector<64x128xf32>
    %10 = tpu.matmul %9, %0, %cst_11 {dimension_numbers = #tpu.dot_dimension_numbers<[1], [0], [0], [1], [0, 0, 1, 1], [], []>} : vector<64x400xbf16>, vector<400x128xbf16>, vector<64x128xf32> -> vector<64x128xf32>
    %11 = arith.maximumf %8, %10 : vector<64x128xf32>
    %c0_12 = arith.constant 0 : index
    %c0_13 = arith.constant 0 : index
    %12 = vector.load %arg6[%c0_12, %c0_13] : memref<1x128xf32, #tpu.memory_space<vmem>>, vector<1x128xf32>
    %13 = vector.broadcast %12 : vector<1x128xf32> to vector<64x128xf32>
    %14 = arith.addf %11, %13 : vector<64x128xf32>
    %cst_14 = arith.constant 0.000000e+00 : f32
    %15 = vector.broadcast %cst_14 : f32 to vector<64x128xf32>
    %16 = arith.maximumf %14, %15 : vector<64x128xf32>
    %17 = arith.truncf %16 : vector<64x128xf32> to vector<64x128xbf16>
    %c0_15 = arith.constant 0 : index
    %c0_16 = arith.constant 0 : index
    %18 = vector.load %arg7[%c0_15, %c0_16] : memref<64x128xbf16, #tpu.memory_space<vmem>>, vector<64x128xbf16>
    tpu.vector_store %arg7[%c0_15, %c0_16], %17 {strides = array<i32>} : memref<64x128xbf16, #tpu.memory_space<vmem>>, vector<64x128xbf16>,
    return
  }
  func.func @transform_0(%arg0: i32) -> (i32, i32) {
    %c0_i32 = arith.constant 0 : i32
    %c0_i32_0 = arith.constant 0 : i32
    return %arg0, %c0_i32 : i32, i32
  }
  func.func @transform_1(%arg0: i32) -> (i32, i32) {
    %c0_i32 = arith.constant 0 : i32
    %c0_i32_0 = arith.constant 0 : i32
    return %arg0, %c0_i32 : i32, i32
  }
  func.func @transform_2(%arg0: i32) -> (i32, i32) {
    %c0_i32 = arith.constant 0 : i32
    %c0_i32_0 = arith.constant 0 : i32
    return %arg0, %c0_i32 : i32, i32
  }
  func.func @transform_3(%arg0: i32) -> (i32, i32) {
    %c0_i32 = arith.constant 0 : i32
    %c0_i32_0 = arith.constant 0 : i32
    return %arg0, %c0_i32 : i32, i32
  }
  func.func @transform_4(%arg0: i32) -> (i32, i32) {
    %c0_i32 = arith.constant 0 : i32
    %c0_i32_0 = arith.constant 0 : i32
    %c0_i32_1 = arith.constant 0 : i32
    return %c0_i32, %c0_i32_0 : i32, i32
  }
  func.func @transform_5(%arg0: i32) -> (i32, i32) {
    %c0_i32 = arith.constant 0 : i32
    %c0_i32_0 = arith.constant 0 : i32
    %c0_i32_1 = arith.constant 0 : i32
    return %c0_i32, %c0_i32_0 : i32, i32
  }
  func.func @transform_6(%arg0: i32) -> (i32, i32) {
    %c0_i32 = arith.constant 0 : i32
    %c0_i32_0 = arith.constant 0 : i32
    return %arg0, %c0_i32 : i32, i32
  }
}

module attributes {stable_mosaic.version = 11 : i64} {
  func.func @linear_kernel(%arg0: memref<16x1568xbf16, #tpu.memory_space<vmem>>, %arg1: memref<1568x128xbf16, #tpu.memory_space<vmem>>, %arg2: memref<1x128xf32, #tpu.memory_space<vmem>>, %arg3: memref<16x128xf32, #tpu.memory_space<vmem>>) attributes {dimension_semantics = [], scalar_prefetch = 0 : i64, scratch_operands = 0 : i64, tpu.core_type = #tpu.core_type<tc>} {
    %c0 = arith.constant 0 : index
    %c0_0 = arith.constant 0 : index
    %0 = vector.load %arg0[%c0, %c0_0] : memref<16x1568xbf16, #tpu.memory_space<vmem>>, vector<16x1568xbf16>
    %c0_1 = arith.constant 0 : index
    %c0_2 = arith.constant 0 : index
    %1 = vector.load %arg1[%c0_1, %c0_2] : memref<1568x128xbf16, #tpu.memory_space<vmem>>, vector<1568x128xbf16>
    %cst = arith.constant dense<0.000000e+00> : vector<16x128xf32>
    %2 = tpu.matmul %0, %1, %cst {dimension_numbers = #tpu.dot_dimension_numbers<[1], [0], [0], [1], [0, 0, 1, 1], [], []>} : vector<16x1568xbf16>, vector<1568x128xbf16>, vector<16x128xf32> -> vector<16x128xf32>
    %c0_3 = arith.constant 0 : index
    %c0_4 = arith.constant 0 : index
    %3 = vector.load %arg2[%c0_3, %c0_4] : memref<1x128xf32, #tpu.memory_space<vmem>>, vector<1x128xf32>
    %4 = vector.broadcast %3 : vector<1x128xf32> to vector<16x128xf32>
    %5 = arith.addf %2, %4 : vector<16x128xf32>
    %c0_5 = arith.constant 0 : index
    %c0_6 = arith.constant 0 : index
    %6 = vector.load %arg3[%c0_5, %c0_6] : memref<16x128xf32, #tpu.memory_space<vmem>>, vector<16x128xf32>
    tpu.vector_store %arg3[%c0_5, %c0_6], %5 {strides = array<i32>} : memref<16x128xf32, #tpu.memory_space<vmem>>, vector<16x128xf32>,
    return
  }
}

</mosaic_0001>

<bundles_post_ra>
// kernel: cnn_forward.3
= control target key start
LH: loop header
LB: loop body
LE: loop exit
PB: predicated region body
PF: predicated region fallthrough
CT: control target
= control target key end

     0   :  { %s2928_s21 = smov 0   ;;  %s2930_s22 = smov 0   ;;  %s3609_s0 = inlined_call_operand.vmem [shape: bf16[392,25], index: 0, kind: input, shape index: {}]   ;;  %s3610_s1 = inlined_call_operand.vmem [shape: bf16[392,25], index: 1, kind: input, shape index: {}]   ;;  %s3611_s2 = inlined_call_operand.vmem [shape: bf16[392,25], index: 2, kind: input, shape index: {}]   ;;  %s3612_s3 = inlined_call_operand.vmem [shape: bf16[392,25], index: 3, kind: input, shape index: {}]   ;;  %s3613_s4 = inlined_call_operand.vmem [shape: bf16[25,128], index: 4, kind: input, shape index: {}]   ;;  %s3614_s5 = inlined_call_operand.vmem [shape: f32[1,128], index: 5, kind: input, shape index: {}]   ;;  %s3615_s6 = inlined_call_operand.vmem [shape: bf16[392,128], index: 6, kind: output, shape index: {}]  }
   0x1   :  { %s2932_s23 = smov 0  }
   0x2 LB: > { %s2941_s24 = sadd.s32 4294967295, %s2856_s23   ;;  %s2943_s25 = sadd.s32 1, %s2856_s23   ;;  %s2856_s23 = sphi %s2932_s23, %s3656_s23   ;;  %s2852_s22 = sphi %s2930_s22, %s3655_s22   ;;  %s2848_s21 = sphi %s2928_s21, %s3654_s21  }
   0x3   : > { %s166_s26 = ssub.s32 %s2856_s23, %s2943_s25  ;;  %s169_s27 = sadd.s32 1, %s2852_s22 }
   0x4   : > { %p167_p0 = scmp.eq.s32.totalorder %s166_s26, 0  ;;  %p179_p1 = scmp.ne.s32.totalorder %s2852_s22, %s2848_s21 }
   0x5   : > { %p180_p2 = scmp.eq.s32.totalorder %s2941_s24, 1  ;;  %p2113_p3 = scmp.ge.s32.totalorder %s2856_s23, 1 }
   0x6   : > { %s2951_s28 = scalar_select %p167_p0, %s2852_s22, %s169_s27  }
   0x7   : > { %p2953_p4 = por %p180_p2, %p179_p1  ;;  %p278_p5 = scmp.lt.s32.totalorder %s2856_s23, 3 }
   0x9   : > { %p279_p6 = pnand %p2113_p3, %p278_p5 }
   0xb   : > { %282 = sbr.rel (%p279_p6) target bundleno = 532 (0x214), region = 44 }
  0x12   : > { %v2744_v0 = vld [vmem:[%s3613_s4] sm:$0xff]   ;;  %v2890_v1 = vmov 0.0   ;;  %v2745_v2 = vld [vmem:[%s3613_s4 + $0x8] sm:$0x1f]   ;;  %vm546_vm0 = vcmask 1043456   ;;  %vm547_vm1 = vcmask 1044480  }
  0x13   : > { %2427 = vmatprep.subr.bf16.mxu0 %v2890_v1  ;;  %2483 = vmatprep.subr.bf16.mxu1 %v2890_v1  ;;  %s2966_s10 = smul.u32 26, %s2941_s24  ;;  %v2891_v3 = vmov 65535   ;;  %vm2892_vm2 = vmmov 0   ;;  %vm506_vm3 = vcmask 203776   ;;  %s335_s9 = sand.u32 1, %s2848_s21  }
  0x14   : > { %2428 = vmatpush3.bf16.msra.mxu0 %v2744_v0  ;;  %2484 = vmatpush3.bf16.msra.mxu1 %v2744_v0  ;;  %v548_v4 = vsel %vm546_vm0, 4294967295, %v2891_v3  ;;  %s2289_s13 = smul.u32 (%p2953_p4), 104, %s2941_s24 }
  0x15   : > { %2429 = vmatprep.subr.bf16.mxu0 %v2890_v1  ;;  %2485 = vmatprep.subr.bf16.mxu1 %v2890_v1  ;;  %v549_v5 = vsel %vm547_vm1, %v548_v4, 0  ;;  %p343_p7 = scmp.lt.s32.totalorder %s2966_s10, 48 }
  0x16   : > { %2431 = vmatprep.mubr.msk.bf16.mxu0 %vm2892_vm2, %v2890_v1  ;;  %2487 = vmatprep.mubr.msk.bf16.mxu1 %vm2892_vm2, %v2890_v1  ;;  %v551_v6 = vand.u32 %v2745_v2, %v549_v5  ;;  %s3498_s16 = scalar_lea.vmem (%p2953_p4), %s3615_s6, %s2289_s13  }
  0x17   : > { %s344_s11 = scalar_select %p343_p7, %s2966_s10, 48 }
  0x18   : > { %2430 = vmatpush3.bf16.msra.mxu0 %v551_v6  ;;  %2486 = vmatpush3.bf16.msra.mxu1 %v551_v6 }
  0x19   : > { %2539 = vmatprep.subr.bf16.mxu0 %v2890_v1  ;;  %s2977_s12 = sshll.u32 %s344_s11, 2  ;;  %2595 = vmatprep.subr.bf16.mxu1 %v2890_v1  ;;  %s2651_s11 = smul.u32 104, %s335_s9 }
  0x1a   : > { %s2984_s15 = scalar_lea.vmem %s3609_s0, %s2977_s12  ;;  %s2991_s18 = scalar_lea.vmem %s3610_s1, %s2977_s12 }
  0x1b   : > { %v2746_v7 = vld [vmem:[%s2984_s15] sm:$0xff]   ;;  %v2748_v9 = vld [vmem:[%s2984_s15 + $0x8] sm:$0xff]   ;;  %v2750_v11 = vld [vmem:[%s2984_s15 + $0x10] sm:$0xff]   ;;  %s3024_s23 = scalar_lea.vmem %s3611_s2, %s2977_s12  ;;  %s3030_s30 = scalar_lea.vmem %s3612_s3, %s2977_s12 }
  0x1c   : > { %v2747_v8 = vld [vmem:[%s2991_s18] sm:$0xff]   ;;  %2432 = vmatmul.mubr.msk.bf16.vlgmr.msra.gmra.mrb[0].mxu0 %vm506_vm3, %v2746_v7  ;;  %v2749_v10 = vld [vmem:[%s2991_s18 + $0x8] sm:$0xff]   ;;  %v2751_v12 = vld [vmem:[%s2991_s18 + $0x10] sm:$0xff]   ;;  %s3386_s21 = scalar_lea.vmem [#allocation2], %s2651_s11   ;;  %s1766_s12 = ssub.s32 (%p2953_p4), 49, %s2966_s10 }
  0x1d   : > { %2488 = vmatmul.mubr.msk.bf16.vlgmr.msra.gmra.mrb[0].mxu1 %vm506_vm3, %v2747_v8  ;;  %2540 = vmatpush3.bf16.msra.mxu0 %v2744_v0  ;;  %v2752_v13 = vld [vmem:[%s2984_s15 + $0x18] sm:$0xff]   ;;  %v2754_v15 = vld [vmem:[%s2984_s15 + $0x20] sm:$0xff]   ;;  %v2756_v17 = vld [vmem:[%s2984_s15 + $0x28] sm:$0xff]   ;;  %p1767_p8 = scmp.lt.s32.totalorder (%p2953_p4), %s1766_s12, 26 }
  0x1e   : > { %2596 = vmatpush3.bf16.msra.mxu1 %v2744_v0  ;;  %2435 = vmatprep.mubr.msk.bf16.mxu0 %vm2892_vm2, %v2890_v1  ;;  %v2753_v14 = vld [vmem:[%s2991_s18 + $0x18] sm:$0xff]   ;;  %v2755_v16 = vld [vmem:[%s2991_s18 + $0x20] sm:$0xff]   ;;  %v2757_v18 = vld [vmem:[%s2991_s18 + $0x28] sm:$0xff]  }
  0x1f   : > { %2491 = vmatprep.mubr.msk.bf16.mxu1 %vm2892_vm2, %v2890_v1  ;;  %2541 = vmatprep.subr.bf16.mxu0 %v2890_v1  ;;  %v2758_v19 = vld [vmem:[%s2984_s15 + $0x30] sm:$0xff]   ;;  %v2760_v21 = vld [vmem:[%s2984_s15 + $0x38] sm:$0xff]   ;;  %v2762_v23 = vld [vmem:[%s2984_s15 + $0x40] sm:$0xff]  }
  0x20   : > { %2597 = vmatprep.subr.bf16.mxu1 %v2890_v1  ;;  %v2759_v20 = vld [vmem:[%s2991_s18 + $0x30] sm:$0xff]   ;;  %v2761_v22 = vld [vmem:[%s2991_s18 + $0x38] sm:$0xff]   ;;  %v2763_v24 = vld [vmem:[%s2991_s18 + $0x40] sm:$0xff]  }
  0x21   : > { %2542 = vmatpush3.bf16.msra.mxu0 %v551_v6  ;;  %v2764_v25 = vld [vmem:[%s2984_s15 + $0x48] sm:$0xff]   ;;  %v2766_v27 = vld [vmem:[%s2984_s15 + $0x50] sm:$0xff]   ;;  %v2768_v29 = vld [vmem:[%s2984_s15 + $0x58] sm:$0xff]  }
  0x22   : > { %2598 = vmatpush3.bf16.msra.mxu1 %v551_v6  ;;  %v2765_v26 = vld [vmem:[%s2991_s18 + $0x48] sm:$0xff]   ;;  %v2767_v28 = vld [vmem:[%s2991_s18 + $0x50] sm:$0xff]   ;;  %v2769_v30 = vld [vmem:[%s2991_s18 + $0x58] sm:$0xff]  }
  0x23   : > { %v2770_v31 = vld [vmem:[%s2984_s15 + $0x60] sm:$0xff]   ;;  %v2774_v35 = vld [vmem:[%s3024_s23 + $0x8] sm:$0xff]   ;;  %v2776_v37 = vld [vmem:[%s3024_s23 + $0x10] sm:$0xff]  }
  0x24   : > { %2436 = vmatmul.mubr.msk.bf16.gmra.mrb[4].mxu0 %vm506_vm3, %v2748_v9  ;;  %v2771_v32 = vld [vmem:[%s2991_s18 + $0x60] sm:$0xff]   ;;  %v2775_v36 = vld [vmem:[%s3030_s30 + $0x8] sm:$0xff]   ;;  %v2777_v38 = vld [vmem:[%s3030_s30 + $0x10] sm:$0xff]  }
  0x25   : > { %2492 = vmatmul.mubr.msk.bf16.gmra.mrb[4].mxu1 %vm506_vm3, %v2749_v10  ;;  %2439 = vmatprep.mubr.msk.bf16.mxu0 %vm2892_vm2, %v2890_v1  ;;  %v2772_v33 = vld [vmem:[%s3024_s23] sm:$0xff]   ;;  %v2778_v39 = vld [vmem:[%s3024_s23 + $0x18] sm:$0xff]   ;;  %v2782_v43 = vld [vmem:[%s3024_s23 + $0x28] sm:$0xff]  }
  0x26   : > { %2495 = vmatprep.mubr.msk.bf16.mxu1 %vm2892_vm2, %v2890_v1  ;;  %v2773_v34 = vld [vmem:[%s3030_s30] sm:$0xff]   ;;  %v2779_v40 = vld [vmem:[%s3030_s30 + $0x18] sm:$0xff]   ;;  %v2783_v44 = vld [vmem:[%s3030_s30 + $0x28] sm:$0xff]  }
  0x27   : > { %v2780_v41 = vld [vmem:[%s3024_s23 + $0x20] sm:$0xff]   ;;  %v2784_v45 = vld [vmem:[%s3024_s23 + $0x30] sm:$0xff]   ;;  %v2786_v47 = vld [vmem:[%s3024_s23 + $0x38] sm:$0xff]  }
  0x28   : > { %v2781_v42 = vld [vmem:[%s3030_s30 + $0x20] sm:$0xff]   ;;  %v2785_v46 = vld [vmem:[%s3030_s30 + $0x30] sm:$0xff]   ;;  %v2787_v48 = vld [vmem:[%s3030_s30 + $0x38] sm:$0xff]  }
  0x29   : > { %v2788_v49 = vld [vmem:[%s3024_s23 + $0x40] sm:$0xff]   ;;  %v2790_v51 = vld [vmem:[%s3024_s23 + $0x48] sm:$0xff]   ;;  %v2792_v53 = vld [vmem:[%s3024_s23 + $0x50] sm:$0xff]  }
  0x2a   : > { %v2789_v50 = vld [vmem:[%s3030_s30 + $0x40] sm:$0xff]   ;;  %v2791_v52 = vld [vmem:[%s3030_s30 + $0x48] sm:$0xff]   ;;  %v2793_v54 = vld [vmem:[%s3030_s30 + $0x50] sm:$0xff]  }
  0x2b   : > { %v2794_v55 = vld [vmem:[%s3024_s23 + $0x58] sm:$0xff]   ;;  %v2796_v57 = vld [vmem:[%s3024_s23 + $0x60] sm:$0xff]  }
  0x2c   : > { %2440 = vmatmul.mubr.msk.bf16.gmra.mrb[8].mxu0 %vm506_vm3, %v2750_v11  ;;  %v2795_v56 = vld [vmem:[%s3030_s30 + $0x58] sm:$0xff]   ;;  %v2797_v58 = vld [vmem:[%s3030_s30 + $0x60] sm:$0xff]  }
  0x2d   : > { %2496 = vmatmul.mubr.msk.bf16.gmra.mrb[8].mxu1 %vm506_vm3, %v2751_v12  ;;  %2443 = vmatprep.mubr.msk.bf16.mxu0 %vm2892_vm2, %v2890_v1 }
  0x2e   : > { %2499 = vmatprep.mubr.msk.bf16.mxu1 %vm2892_vm2, %v2890_v1 }
  0x34   : > { %2444 = vmatmul.mubr.msk.bf16.gmra.mrb[12].mxu0 %vm506_vm3, %v2752_v13 }
  0x35   : > { %2500 = vmatmul.mubr.msk.bf16.gmra.mrb[12].mxu1 %vm506_vm3, %v2753_v14  ;;  %2447 = vmatprep.mubr.msk.bf16.mxu0 %vm2892_vm2, %v2890_v1 }
  0x36   : > { %2503 = vmatprep.mubr.msk.bf16.mxu1 %vm2892_vm2, %v2890_v1 }
  0x3c   : > { %2448 = vmatmul.mubr.msk.bf16.gmra.mrb[16].mxu0 %vm506_vm3, %v2754_v15 }
  0x3d   : > { %2504 = vmatmul.mubr.msk.bf16.gmra.mrb[16].mxu1 %vm506_vm3, %v2755_v16  ;;  %2451 = vmatprep.mubr.msk.bf16.mxu0 %vm2892_vm2, %v2890_v1 }
  0x3e   : > { %2507 = vmatprep.mubr.msk.bf16.mxu1 %vm2892_vm2, %v2890_v1 }
  0x44   : > { %2452 = vmatmul.mubr.msk.bf16.gmra.mrb[20].mxu0 %vm506_vm3, %v2756_v17 }
  0x45   : > { %2508 = vmatmul.mubr.msk.bf16.gmra.mrb[20].mxu1 %vm506_vm3, %v2757_v18  ;;  %2455 = vmatprep.mubr.msk.bf16.mxu0 %vm2892_vm2, %v2890_v1 }
  0x46   : > { %2511 = vmatprep.mubr.msk.bf16.mxu1 %vm2892_vm2, %v2890_v1 }
  0x4c   : > { %2456 = vmatmul.mubr.msk.bf16.gmra.mrb[24].mxu0 %vm506_vm3, %v2758_v19 }
  0x4d   : > { %2512 = vmatmul.mubr.msk.bf16.gmra.mrb[24].mxu1 %vm506_vm3, %v2759_v20  ;;  %2459 = vmatprep.mubr.msk.bf16.mxu0 %vm2892_vm2, %v2890_v1 }
  0x4e   : > { %2515 = vmatprep.mubr.msk.bf16.mxu1 %vm2892_vm2, %v2890_v1 }
  0x54   : > { %2460 = vmatmul.mubr.msk.bf16.gmra.mrb[28].mxu0 %vm506_vm3, %v2760_v21 }
  0x55   : > { %2516 = vmatmul.mubr.msk.bf16.gmra.mrb[28].mxu1 %vm506_vm3, %v2761_v22  ;;  %2463 = vmatprep.mubr.msk.bf16.mxu0 %vm2892_vm2, %v2890_v1 }
  0x56   : > { %2519 = vmatprep.mubr.msk.bf16.mxu1 %vm2892_vm2, %v2890_v1 }
  0x5c   : > { %2464 = vmatmul.mubr.msk.bf16.gmra.mrb[32].mxu0 %vm506_vm3, %v2762_v23 }
  0x5d   : > { %2520 = vmatmul.mubr.msk.bf16.gmra.mrb[32].mxu1 %vm506_vm3, %v2763_v24  ;;  %2467 = vmatprep.mubr.msk.bf16.mxu0 %vm2892_vm2, %v2890_v1 }
  0x5e   : > { %2523 = vmatprep.mubr.msk.bf16.mxu1 %vm2892_vm2, %v2890_v1 }
  0x64   : > { %2468 = vmatmul.mubr.msk.bf16.gmra.mrb[36].mxu0 %vm506_vm3, %v2764_v25 }
  0x65   : > { %2524 = vmatmul.mubr.msk.bf16.gmra.mrb[36].mxu1 %vm506_vm3, %v2765_v26  ;;  %2471 = vmatprep.mubr.msk.bf16.mxu0 %vm2892_vm2, %v2890_v1 }
  0x66   : > { %2527 = vmatprep.mubr.msk.bf16.mxu1 %vm2892_vm2, %v2890_v1 }
  0x6c   : > { %2472 = vmatmul.mubr.msk.bf16.gmra.mrb[40].mxu0 %vm506_vm3, %v2766_v27 }
  0x6d   : > { %2528 = vmatmul.mubr.msk.bf16.gmra.mrb[40].mxu1 %vm506_vm3, %v2767_v28  ;;  %2475 = vmatprep.mubr.msk.bf16.mxu0 %vm2892_vm2, %v2890_v1 }
  0x6e   : > { %2531 = vmatprep.mubr.msk.bf16.mxu1 %vm2892_vm2, %v2890_v1 }
  0x74   : > { %2476 = vmatmul.mubr.msk.bf16.gmra.mrb[44].mxu0 %vm506_vm3, %v2768_v29 }
  0x75   : > { %2532 = vmatmul.mubr.msk.bf16.gmra.mrb[44].mxu1 %vm506_vm3, %v2769_v30  ;;  %2479 = vmatprep.mubr.msk.bf16.mxu0 %vm2892_vm2, %v2890_v1 }
  0x76   : > { %2535 = vmatprep.mubr.msk.bf16.mxu1 %vm2892_vm2, %v2890_v1 }
  0x7c   : > { %2480 = vmatmul.mubr.msk.bf16.gmra.mrb[48].mxu0 %vm506_vm3, %v2770_v31 }
  0x7d   : > { %2536 = vmatmul.mubr.msk.bf16.gmra.mrb[48].mxu1 %vm506_vm3, %v2771_v32  ;;  %2543 = vmatprep.mubr.msk.bf16.mxu0 %vm2892_vm2, %v2890_v1 }
  0x7e   : > { %2599 = vmatprep.mubr.msk.bf16.mxu1 %vm2892_vm2, %v2890_v1 }
  0x84   : > { %2544 = vmatmul.mubr.msk.bf16.vlgmr.msra.gmra.mrb[52].mxu0 %vm506_vm3, %v2772_v33 }
  0x85   : > { %2600 = vmatmul.mubr.msk.bf16.vlgmr.msra.gmra.mrb[52].mxu1 %vm506_vm3, %v2773_v34  ;;  %2547 = vmatprep.mubr.msk.bf16.mxu0 %vm2892_vm2, %v2890_v1 }
  0x86   : > { %2603 = vmatprep.mubr.msk.bf16.mxu1 %vm2892_vm2, %v2890_v1 }
  0x8c   : > { %2548 = vmatmul.mubr.msk.bf16.gmra.mrb[56].mxu0 %vm506_vm3, %v2774_v35 }
  0x8d   : > { %2604 = vmatmul.mubr.msk.bf16.gmra.mrb[56].mxu1 %vm506_vm3, %v2775_v36  ;;  %2551 = vmatprep.mubr.msk.bf16.mxu0 %vm2892_vm2, %v2890_v1 }
  0x8e   : > { %2607 = vmatprep.mubr.msk.bf16.mxu1 %vm2892_vm2, %v2890_v1 }
  0x94   : > { %2552 = vmatmul.mubr.msk.bf16.gmra.mrb[60].mxu0 %vm506_vm3, %v2776_v37 }
  0x95   : > { %2608 = vmatmul.mubr.msk.bf16.gmra.mrb[60].mxu1 %vm506_vm3, %v2777_v38  ;;  %2555 = vmatprep.mubr.msk.bf16.mxu0 %vm2892_vm2, %v2890_v1 }
  0x96   : > { %2611 = vmatprep.mubr.msk.bf16.mxu1 %vm2892_vm2, %v2890_v1 }
  0x9c   : > { %2556 = vmatmul.mubr.msk.bf16.gmra.mrb[64].mxu0 %vm506_vm3, %v2778_v39 }
  0x9d   : > { %2612 = vmatmul.mubr.msk.bf16.gmra.mrb[64].mxu1 %vm506_vm3, %v2779_v40  ;;  %2559 = vmatprep.mubr.msk.bf16.mxu0 %vm2892_vm2, %v2890_v1 }
  0x9e   : > { %2615 = vmatprep.mubr.msk.bf16.mxu1 %vm2892_vm2, %v2890_v1 }
  0xa4   : > { %2560 = vmatmul.mubr.msk.bf16.gmra.mrb[68].mxu0 %vm506_vm3, %v2780_v41 }
  0xa5   : > { %2616 = vmatmul.mubr.msk.bf16.gmra.mrb[68].mxu1 %vm506_vm3, %v2781_v42  ;;  %2563 = vmatprep.mubr.msk.bf16.mxu0 %vm2892_vm2, %v2890_v1 }
  0xa6   : > { %2619 = vmatprep.mubr.msk.bf16.mxu1 %vm2892_vm2, %v2890_v1 }
  0xac   : > { %2564 = vmatmul.mubr.msk.bf16.gmra.mrb[72].mxu0 %vm506_vm3, %v2782_v43 }
  0xad   : > { %2620 = vmatmul.mubr.msk.bf16.gmra.mrb[72].mxu1 %vm506_vm3, %v2783_v44  ;;  %2567 = vmatprep.mubr.msk.bf16.mxu0 %vm2892_vm2, %v2890_v1 }
  0xae   : > { %2623 = vmatprep.mubr.msk.bf16.mxu1 %vm2892_vm2, %v2890_v1 }
  0xb4   : > { %2568 = vmatmul.mubr.msk.bf16.gmra.mrb[76].mxu0 %vm506_vm3, %v2784_v45 }
  0xb5   : > { %2624 = vmatmul.mubr.msk.bf16.gmra.mrb[76].mxu1 %vm506_vm3, %v2785_v46  ;;  %2571 = vmatprep.mubr.msk.bf16.mxu0 %vm2892_vm2, %v2890_v1 }
  0xb6   : > { %2627 = vmatprep.mubr.msk.bf16.mxu1 %vm2892_vm2, %v2890_v1 }
  0xbc   : > { %2572 = vmatmul.mubr.msk.bf16.gmra.mrb[80].mxu0 %vm506_vm3, %v2786_v47 }
  0xbd   : > { %2628 = vmatmul.mubr.msk.bf16.gmra.mrb[80].mxu1 %vm506_vm3, %v2787_v48  ;;  %2575 = vmatprep.mubr.msk.bf16.mxu0 %vm2892_vm2, %v2890_v1 }
  0xbe   : > { %2631 = vmatprep.mubr.msk.bf16.mxu1 %vm2892_vm2, %v2890_v1 }
  0xc4   : > { %2576 = vmatmul.mubr.msk.bf16.gmra.mrb[84].mxu0 %vm506_vm3, %v2788_v49 }
  0xc5   : > { %2632 = vmatmul.mubr.msk.bf16.gmra.mrb[84].mxu1 %vm506_vm3, %v2789_v50  ;;  %2579 = vmatprep.mubr.msk.bf16.mxu0 %vm2892_vm2, %v2890_v1 }
  0xc6   : > { %2635 = vmatprep.mubr.msk.bf16.mxu1 %vm2892_vm2, %v2890_v1 }
  0xcc   : > { %2580 = vmatmul.mubr.msk.bf16.gmra.mrb[88].mxu0 %vm506_vm3, %v2790_v51 }
  0xcd   : > { %2636 = vmatmul.mubr.msk.bf16.gmra.mrb[88].mxu1 %vm506_vm3, %v2791_v52  ;;  %2583 = vmatprep.mubr.msk.bf16.mxu0 %vm2892_vm2, %v2890_v1 }
  0xce   : > { %2639 = vmatprep.mubr.msk.bf16.mxu1 %vm2892_vm2, %v2890_v1 }
  0xd4   : > { %2584 = vmatmul.mubr.msk.bf16.gmra.mrb[92].mxu0 %vm506_vm3, %v2792_v53 }
  0xd5   : > { %2640 = vmatmul.mubr.msk.bf16.gmra.mrb[92].mxu1 %vm506_vm3, %v2793_v54  ;;  %2587 = vmatprep.mubr.msk.bf16.mxu0 %vm2892_vm2, %v2890_v1 }
  0xd6   : > { %2643 = vmatprep.mubr.msk.bf16.mxu1 %vm2892_vm2, %v2890_v1 }
  0xdc   : > { %2588 = vmatmul.mubr.msk.bf16.gmra.mrb[96].mxu0 %vm506_vm3, %v2794_v55 }
  0xdd   : > { %2644 = vmatmul.mubr.msk.bf16.gmra.mrb[96].mxu1 %vm506_vm3, %v2795_v56  ;;  %2591 = vmatprep.mubr.msk.bf16.mxu0 %vm2892_vm2, %v2890_v1 }
  0xde   : > { %2647 = vmatprep.mubr.msk.bf16.mxu1 %vm2892_vm2, %v2890_v1 }
  0xe4   : > { %2592 = vmatmul.mubr.msk.bf16.gmra.mrb[100].mxu0 %vm506_vm3, %v2796_v57 }
  0xe5   : > { %2648 = vmatmul.mubr.msk.bf16.gmra.mrb[100].mxu1 %vm506_vm3, %v2797_v58 }
  0xef   : > { %v3210_v59 = vpop.f32.mrb[0].mxu0 }
  0xf0   : > { %v3212_v60 = vpop.f32.mrb[0].mxu1  ;;  %v2433_v61 = vpop.f32.mrb[1].mxu0 }
  0xf1   : > { %v957_v62 = vmax.f32 %v3210_v59, %v3212_v60  ;;  %v2489_v63 = vpop.f32.mrb[1].mxu1  ;;  %v3216_v0 = vpop.f32.mrb[2].mxu0 }
  0xf2   : > { %v3218_v2 = vpop.f32.mrb[2].mxu1  ;;  %v2434_v1 = vpop.f32.mrb[3].mxu0 }
  0xf3   : > { %v2490_v4 = vpop.f32.mrb[3].mxu1 }
  0xf7   : > { %v3222_v5 = vpop.f32.mrb[4].mxu0 }
  0xf8   : > { %v3224_v6 = vpop.f32.mrb[4].mxu1  ;;  %v2437_v7 = vpop.f32.mrb[5].mxu0 }
  0xf9   : > { %v2493_v9 = vpop.f32.mrb[5].mxu1  ;;  %v3228_v10 = vpop.f32.mrb[6].mxu0 }
  0xfa   : > { %v3230_v11 = vpop.f32.mrb[6].mxu1  ;;  %v2438_v12 = vpop.f32.mrb[7].mxu0 }
  0xfb   : > { %v2494_v14 = vpop.f32.mrb[7].mxu1 }
  0xff   : > { %v3234_v15 = vpop.f32.mrb[8].mxu0 }
 0x100   : > { %v3236_v16 = vpop.f32.mrb[8].mxu1  ;;  %v2441_v17 = vpop.f32.mrb[9].mxu0 }
 0x101   : > { %v2497_v19 = vpop.f32.mrb[9].mxu1  ;;  %v3240_v20 = vpop.f32.mrb[10].mxu0 }
 0x102   : > { %v3242_v21 = vpop.f32.mrb[10].mxu1  ;;  %v2442_v22 = vpop.f32.mrb[11].mxu0 }
 0x103   : > { %v2498_v24 = vpop.f32.mrb[11].mxu1 }
 0x107   : > { %v3246_v25 = vpop.f32.mrb[12].mxu0 }
 0x108   : > { %v3248_v26 = vpop.f32.mrb[12].mxu1  ;;  %v2445_v27 = vpop.f32.mrb[13].mxu0 }
 0x109   : > { %v2501_v29 = vpop.f32.mrb[13].mxu1  ;;  %v3252_v30 = vpop.f32.mrb[14].mxu0 }
 0x10a   : > { %v3254_v31 = vpop.f32.mrb[14].mxu1  ;;  %v2446_v32 = vpop.f32.mrb[15].mxu0 }
 0x10b   : > { %v2502_v34 = vpop.f32.mrb[15].mxu1 }
 0x10f   : > { %v3258_v35 = vpop.f32.mrb[16].mxu0 }
 0x110   : > { %v3260_v36 = vpop.f32.mrb[16].mxu1  ;;  %v2449_v37 = vpop.f32.mrb[17].mxu0 }
 0x111   : > { %v2505_v39 = vpop.f32.mrb[17].mxu1  ;;  %v3264_v40 = vpop.f32.mrb[18].mxu0 }
 0x112   : > { %v3266_v41 = vpop.f32.mrb[18].mxu1  ;;  %v2450_v42 = vpop.f32.mrb[19].mxu0 }
 0x113   : > { %v2506_v44 = vpop.f32.mrb[19].mxu1 }
 0x117   : > { %v3270_v45 = vpop.f32.mrb[20].mxu0 }
 0x118   : > { %v3272_v46 = vpop.f32.mrb[20].mxu1  ;;  %v2453_v47 = vpop.f32.mrb[21].mxu0 }
 0x119   : > { %v2509_v49 = vpop.f32.mrb[21].mxu1  ;;  %v3276_v50 = vpop.f32.mrb[22].mxu0 }
 0x11a   : > { %v3278_v51 = vpop.f32.mrb[22].mxu1  ;;  %v2454_v52 = vpop.f32.mrb[23].mxu0 }
 0x11b   : > { %v2510_v54 = vpop.f32.mrb[23].mxu1 }
 0x11f   : > { %v3282_v55 = vpop.f32.mrb[24].mxu0 }
 0x120   : > { %v3284_v56 = vpop.f32.mrb[24].mxu1  ;;  %v2457_v57 = vpop.f32.mrb[25].mxu0 }
 0x121   : > { %v2513_v61 = vpop.f32.mrb[25].mxu1  ;;  %v3288_v63 = vpop.f32.mrb[26].mxu0 }
 0x122   : > { %v3290_v1 = vpop.f32.mrb[26].mxu1  ;;  %v2458_v4 = vpop.f32.mrb[27].mxu0 }
 0x123   : > { %v2514_v9 = vpop.f32.mrb[27].mxu1 }
 0x127   : > { %v3294_v12 = vpop.f32.mrb[28].mxu0 }
 0x128   : > { %v3296_v14 = vpop.f32.mrb[28].mxu1  ;;  %v2461_v17 = vpop.f32.mrb[29].mxu0 }
 0x129   : > { %v2517_v22 = vpop.f32.mrb[29].mxu1  ;;  %v3300_v24 = vpop.f32.mrb[30].mxu0 }
 0x12a   : > { %v3302_v27 = vpop.f32.mrb[30].mxu1  ;;  %v2462_v29 = vpop.f32.mrb[31].mxu0 }
 0x12b   : > { %v2518_v34 = vpop.f32.mrb[31].mxu1 }
 0x12f   : > { %v3306_v37 = vpop.f32.mrb[32].mxu0 }
 0x130   : > { %v3308_v39 = vpop.f32.mrb[32].mxu1  ;;  %v2465_v42 = vpop.f32.mrb[33].mxu0 }
 0x131   : > { %v2521_v47 = vpop.f32.mrb[33].mxu1  ;;  %v3312_v49 = vpop.f32.mrb[34].mxu0 }
 0x132   : > { %v3314_v52 = vpop.f32.mrb[34].mxu1  ;;  %v2466_v54 = vpop.f32.mrb[35].mxu0 }
 0x133   : > { %v2522_v61 = vpop.f32.mrb[35].mxu1 }
 0x137   : > { %v3318_v4 = vpop.f32.mrb[36].mxu0 }
 0x138   : > { %v3320_v9 = vpop.f32.mrb[36].mxu1  ;;  %v2469_v17 = vpop.f32.mrb[37].mxu0 }
 0x139   : > { %v2525_v29 = vpop.f32.mrb[37].mxu1  ;;  %v3324_v34 = vpop.f32.mrb[38].mxu0 }
 0x13a   : > { %v3326_v42 = vpop.f32.mrb[38].mxu1  ;;  %v2470_v47 = vpop.f32.mrb[39].mxu0 }
 0x13b   : > { %v2526_v44 = vpop.f32.mrb[39].mxu1 }
 0x13f   : > { %v3330_v57 = vpop.f32.mrb[40].mxu0 }
 0x140   : > { %v3332_v61 = vpop.f32.mrb[40].mxu1  ;;  %v2473_v32 = vpop.f32.mrb[41].mxu0 }
 0x141   : > { %v2529_v19 = vpop.f32.mrb[41].mxu1  ;;  %v3336_v22 = vpop.f32.mrb[42].mxu0 }
 0x142   : > { %v3338_v29 = vpop.f32.mrb[42].mxu1  ;;  %v2474_v7 = vpop.f32.mrb[43].mxu0 }
 0x143   : > { %v2530_v58 = vpop.f32.mrb[43].mxu1 }
 0x147   : > { %v3342_v54 = vpop.f32.mrb[44].mxu0 }
 0x148   : > { %v3344_v44 = vpop.f32.mrb[44].mxu1  ;;  %v2477_v53 = vpop.f32.mrb[45].mxu0 }
 0x149   : > { %v2533_v48 = vpop.f32.mrb[45].mxu1  ;;  %v3348_v17 = vpop.f32.mrb[46].mxu0 }
 0x14a   : > { %v3350_v19 = vpop.f32.mrb[46].mxu1  ;;  %v2478_v43 = vpop.f32.mrb[47].mxu0 }
 0x14b   : > { %v2534_v38 = vpop.f32.mrb[47].mxu1 }
 0x14f   : > { %v3354_v47 = vpop.f32.mrb[48].mxu0 }
 0x150   : > { %v3356_v58 = vpop.f32.mrb[48].mxu1  ;;  %v2481_v33 = vpop.f32.mrb[49].mxu0 }
 0x151   : > { %3620 = vst [vmem:[#allocation3_spill] sm:$0xff] %v3356_v58  ;;  %v2537_v32 = vpop.f32.mrb[49].mxu1  ;;  %v3360_v48 = vpop.f32.mrb[50].mxu0 }
 0x152   : > { %3621 = vst [vmem:[#allocation4_spill] sm:$0xff] %v3360_v48  ;;  %v3362_v28 = vpop.f32.mrb[50].mxu1  ;;  %v2482_v23 = vpop.f32.mrb[51].mxu0  ;;  %v3372_v32 = vld [vmem:[%s3614_s5] ss:$0 sm:$0xff] }
 0x153   : > { %3622 = vst [vmem:[#allocation5_spill] sm:$0xff] %v3362_v28  ;;  %v2538_v7 = vpop.f32.mrb[51].mxu1  ;;  %v3623_v23 = vmax.f32 %v3216_v0, %v3218_v2 }
 0x157   : > { %v1147_v38 = vpop.f32.mrb[52].mxu0 }
 0x158   : > { %v1250_v18 = vmax.f32 %v957_v62, %v1147_v38  ;;  %v1440_v33 = vpop.f32.mrb[52].mxu1  ;;  %v2545_v13 = vpop.f32.mrb[53].mxu0 }
 0x159   : > { %v2601_v53 = vpop.f32.mrb[53].mxu1  ;;  %v1150_v8 = vpop.f32.mrb[54].mxu0 }
 0x15a   : > { %v1543_v3 = vmax.f32 %v1250_v18, %v1440_v33  ;;  %v1251_v43 = vmax.f32 %v3623_v23, %v1150_v8  ;;  %v1443_v7 = vpop.f32.mrb[54].mxu1  ;;  %v2546_v28 = vpop.f32.mrb[55].mxu0  ;;  %v3624_v18 = vmax.f32 %v3222_v5, %v3224_v6 }
 0x15b   : > { %v2602_v48 = vpop.f32.mrb[55].mxu1 }
 0x15c   : > { %v1576_v59 = vadd.f32 %v3372_v32, %v1543_v3  ;;  %v1544_v60 = vmax.f32 %v1251_v43, %v1443_v7  ;;  %v3625_v3 = vmax.f32 %v3228_v10, %v3230_v11  ;;  %v3626_v10 = vmax.f32 %v3234_v15, %v3236_v16 }
 0x15e   : > { %v1577_v62 = vadd.f32 %v3372_v32, %v1544_v60  ;;  %v1602_v38 = vmax.f32 %v1576_v59, 0.0 }
 0x15f   : > { %v1155_v13 = vpop.f32.mrb[56].mxu0 }
 0x160   : > { %v1603_v58 = vmax.f32 %v1577_v62, 0.0  ;;  %v1252_v53 = vmax.f32 %v3624_v18, %v1155_v13  ;;  %v1448_v33 = vpop.f32.mrb[56].mxu1  ;;  %v2549_v0 = vpop.f32.mrb[57].mxu0 }
 0x161   : > { %v2605_v2 = vpop.f32.mrb[57].mxu1  ;;  %v1158_v8 = vpop.f32.mrb[58].mxu0 }
 0x162   : > { %v2293_v23 = vpack.c.bf16 %v1603_v58, %v1602_v38  ;;  %v1545_v28 = vmax.f32 %v1252_v53, %v1448_v33  ;;  %v1253_v48 = vmax.f32 %v3625_v3, %v1158_v8  ;;  %v1451_v43 = vpop.f32.mrb[58].mxu1  ;;  %v2550_v7 = vpop.f32.mrb[59].mxu0  ;;  %v3627_v8 = vmax.f32 %v3240_v20, %v3242_v21 }
 0x163   : > { %v2606_v60 = vpop.f32.mrb[59].mxu1 }
 0x164   : > { %2294 = vst [vmem:[%s3386_s21] sm:$0xff] %v2293_v23   ;;  %v1578_v5 = vadd.f32 %v3372_v32, %v1545_v28  ;;  %v1546_v6 = vmax.f32 %v1253_v48, %v1451_v43 }
 0x166   : > { %v1579_v59 = vadd.f32 %v3372_v32, %v1546_v6  ;;  %v1604_v58 = vmax.f32 %v1578_v5, 0.0  ;;  %v3628_v6 = vmax.f32 %v3246_v25, %v3248_v26 }
 0x167   : > { %v1163_v62 = vpop.f32.mrb[60].mxu0 }
 0x168   : > { %v1605_v13 = vmax.f32 %v1579_v59, 0.0  ;;  %v1254_v11 = vmax.f32 %v3626_v10, %v1163_v62  ;;  %v1456_v38 = vpop.f32.mrb[60].mxu1  ;;  %v2553_v18 = vpop.f32.mrb[61].mxu0 }
 0x169   : > { %v2609_v53 = vpop.f32.mrb[61].mxu1  ;;  %v1166_v33 = vpop.f32.mrb[62].mxu0 }
 0x16a   : > { %v2298_v0 = vpack.c.bf16 %v1605_v13, %v1604_v58  ;;  %v1547_v2 = vmax.f32 %v1254_v11, %v1456_v38  ;;  %v1255_v23 = vmax.f32 %v3627_v8, %v1166_v33  ;;  %v1459_v28 = vpop.f32.mrb[62].mxu1  ;;  %v2554_v3 = vpop.f32.mrb[63].mxu0  ;;  %v3629_v11 = vmax.f32 %v3252_v30, %v3254_v31 }
 0x16b   : > { %v2610_v48 = vpop.f32.mrb[63].mxu1 }
 0x16c   : > { %2355 = vst [vmem:[%s3386_s21 + $0x8] sm:$0xff] %v2298_v0   ;;  %v1580_v43 = vadd.f32 %v3372_v32, %v1547_v2  ;;  %v1548_v7 = vmax.f32 %v1255_v23, %v1459_v28  ;;  %v3630_v28 = vmax.f32 %v3258_v35, %v3260_v36 }
 0x16e   : > { %v1581_v15 = vadd.f32 %v3372_v32, %v1548_v7  ;;  %v1606_v60 = vmax.f32 %v1580_v43, 0.0 }
 0x16f   : > { %v1171_v16 = vpop.f32.mrb[64].mxu0 }
 0x170   : > { %v1607_v5 = vmax.f32 %v1581_v15, 0.0  ;;  %v1256_v59 = vmax.f32 %v3628_v6, %v1171_v16  ;;  %v1464_v62 = vpop.f32.mrb[64].mxu1  ;;  %v2557_v20 = vpop.f32.mrb[65].mxu0  ;;  %v3631_v16 = vmax.f32 %v3264_v40, %v3266_v41 }
 0x171   : > { %v2613_v21 = vpop.f32.mrb[65].mxu1  ;;  %v1174_v58 = vpop.f32.mrb[66].mxu0 }
 0x172   : > { %v2303_v13 = vpack.c.bf16 %v1607_v5, %v1606_v60  ;;  %v1549_v10 = vmax.f32 %v1256_v59, %v1464_v62  ;;  %v1257_v38 = vmax.f32 %v3629_v11, %v1174_v58  ;;  %v1467_v18 = vpop.f32.mrb[66].mxu1  ;;  %v2558_v53 = vpop.f32.mrb[67].mxu0 }
 0x173   : > { %v2614_v33 = vpop.f32.mrb[67].mxu1 }
 0x174   : > { %2356 = vst [vmem:[%s3386_s21 + $0x10] sm:$0xff] %v2303_v13   ;;  %v1582_v0 = vadd.f32 %v3372_v32, %v1549_v10  ;;  %v1550_v2 = vmax.f32 %v1257_v38, %v1467_v18  ;;  %v3632_v13 = vmax.f32 %v3270_v45, %v3272_v46  ;;  %v3633_v33 = vmax.f32 %v3276_v50, %v3278_v51 }
 0x176   : > { %v1583_v25 = vadd.f32 %v3372_v32, %v1550_v2  ;;  %v1608_v8 = vmax.f32 %v1582_v0, 0.0 }
 0x177   : > { %v1179_v26 = vpop.f32.mrb[68].mxu0 }
 0x178   : > { %v1609_v23 = vmax.f32 %v1583_v25, 0.0  ;;  %v1258_v3 = vmax.f32 %v3630_v28, %v1179_v26  ;;  %v1472_v48 = vpop.f32.mrb[68].mxu1  ;;  %v2561_v30 = vpop.f32.mrb[69].mxu0 }
 0x179   : > { %v2617_v31 = vpop.f32.mrb[69].mxu1  ;;  %v1182_v43 = vpop.f32.mrb[70].mxu0 }
 0x17a   : > { %v2308_v7 = vpack.c.bf16 %v1609_v23, %v1608_v8  ;;  %v1551_v15 = vmax.f32 %v1258_v3, %v1472_v48  ;;  %v1259_v60 = vmax.f32 %v3631_v16, %v1182_v43  ;;  %v1475_v5 = vpop.f32.mrb[70].mxu1  ;;  %v2562_v6 = vpop.f32.mrb[71].mxu0  ;;  %v3634_v48 = vmax.f32 %v3282_v55, %v3284_v56 }
 0x17b   : > { %v2618_v59 = vpop.f32.mrb[71].mxu1  ;;  %v3635_v16 = vmax.f32 %v3288_v63, %v3290_v1 }
 0x17c   : > { %2357 = vst [vmem:[%s3386_s21 + $0x18] sm:$0xff] %v2308_v7   ;;  %v1584_v62 = vadd.f32 %v3372_v32, %v1551_v15  ;;  %v1552_v20 = vmax.f32 %v1259_v60, %v1475_v5 }
 0x17e   : > { %v1585_v35 = vadd.f32 %v3372_v32, %v1552_v20  ;;  %v1610_v21 = vmax.f32 %v1584_v62, 0.0 }
 0x17f   : > { %v1187_v36 = vpop.f32.mrb[72].mxu0 }
 0x180   : > { %v1611_v58 = vmax.f32 %v1585_v35, 0.0  ;;  %v1260_v10 = vmax.f32 %v3632_v13, %v1187_v36  ;;  %v1480_v11 = vpop.f32.mrb[72].mxu1  ;;  %v2565_v40 = vpop.f32.mrb[73].mxu0 }
 0x181   : > { %v2621_v41 = vpop.f32.mrb[73].mxu1  ;;  %v1190_v38 = vpop.f32.mrb[74].mxu0 }
 0x182   : > { %v2313_v18 = vpack.c.bf16 %v1611_v58, %v1610_v21  ;;  %v1553_v53 = vmax.f32 %v1260_v10, %v1480_v11  ;;  %v1261_v0 = vmax.f32 %v3633_v33, %v1190_v38  ;;  %v1483_v2 = vpop.f32.mrb[74].mxu1  ;;  %v2566_v25 = vpop.f32.mrb[75].mxu0  ;;  %v3636_v21 = vmax.f32 %v3294_v12, %v3296_v14 }
 0x183   : > { %v2622_v26 = vpop.f32.mrb[75].mxu1  ;;  %v3637_v41 = vmax.f32 %v3300_v24, %v3302_v27 }
 0x184   : > { %2358 = vst [vmem:[%s3386_s21 + $0x20] sm:$0xff] %v2313_v18   ;;  %v1586_v8 = vadd.f32 %v3372_v32, %v1553_v53  ;;  %v1554_v23 = vmax.f32 %v1261_v0, %v1483_v2 }
 0x186   : > { %v1587_v45 = vadd.f32 %v3372_v32, %v1554_v23  ;;  %v1612_v28 = vmax.f32 %v1586_v8, 0.0  ;;  %v3638_v8 = vmax.f32 %v3306_v37, %v3308_v39 }
 0x187   : > { %v1195_v46 = vpop.f32.mrb[76].mxu0 }
 0x188   : > { %v1613_v3 = vmax.f32 %v1587_v45, 0.0  ;;  %v1262_v30 = vmax.f32 %v3634_v48, %v1195_v46  ;;  %v1488_v31 = vpop.f32.mrb[76].mxu1  ;;  %v2569_v50 = vpop.f32.mrb[77].mxu0  ;;  %v3639_v48 = vmax.f32 %v3312_v49, %v3314_v52 }
 0x189   : > { %v2625_v51 = vpop.f32.mrb[77].mxu1  ;;  %v1198_v43 = vpop.f32.mrb[78].mxu0 }
 0x18a   : > { %v2318_v7 = vpack.c.bf16 %v1613_v3, %v1612_v28  ;;  %v1555_v15 = vmax.f32 %v1262_v30, %v1488_v31  ;;  %v1263_v60 = vmax.f32 %v3635_v16, %v1198_v43  ;;  %v1491_v5 = vpop.f32.mrb[78].mxu1  ;;  %v2570_v6 = vpop.f32.mrb[79].mxu0 }
 0x18b   : > { %v2626_v59 = vpop.f32.mrb[79].mxu1 }
 0x18c   : > { %2359 = vst [vmem:[%s3386_s21 + $0x28] sm:$0xff] %v2318_v7   ;;  %v1588_v62 = vadd.f32 %v3372_v32, %v1555_v15  ;;  %v1556_v20 = vmax.f32 %v1263_v60, %v1491_v5  ;;  %v3640_v60 = vmax.f32 %v3318_v4, %v3320_v9 }
 0x18e   : > { %v1589_v55 = vadd.f32 %v3372_v32, %v1556_v20  ;;  %v1614_v35 = vmax.f32 %v1588_v62, 0.0 }
 0x18f   : > { %v1203_v56 = vpop.f32.mrb[80].mxu0 }
 0x190   : > { %v1615_v36 = vmax.f32 %v1589_v55, 0.0  ;;  %v1264_v58 = vmax.f32 %v3636_v21, %v1203_v56  ;;  %v1496_v13 = vpop.f32.mrb[80].mxu1  ;;  %v2573_v63 = vpop.f32.mrb[81].mxu0  ;;  %v3641_v55 = vmax.f32 %v3324_v34, %v3326_v42 }
 0x191   : > { %v2629_v1 = vpop.f32.mrb[81].mxu1  ;;  %v1206_v10 = vpop.f32.mrb[82].mxu0 }
 0x192   : > { %v2323_v11 = vpack.c.bf16 %v1615_v36, %v1614_v35  ;;  %v1557_v40 = vmax.f32 %v1264_v58, %v1496_v13  ;;  %v1265_v38 = vmax.f32 %v3637_v41, %v1206_v10  ;;  %v1499_v18 = vpop.f32.mrb[82].mxu1  ;;  %v2574_v53 = vpop.f32.mrb[83].mxu0  ;;  %v3642_v10 = vmax.f32 %v3330_v57, %v3332_v61 }
 0x193   : > { %v2630_v33 = vpop.f32.mrb[83].mxu1  ;;  %v3643_v53 = vmax.f32 %v3336_v22, %v3338_v29 }
 0x194   : > { %2360 = vst [vmem:[%s3386_s21 + $0x30] sm:$0xff] %v2323_v11   ;;  %v1590_v0 = vadd.f32 %v3372_v32, %v1557_v40  ;;  %v1558_v2 = vmax.f32 %v1265_v38, %v1499_v18 }
 0x196   : > { %v1591_v12 = vadd.f32 %v3372_v32, %v1558_v2  ;;  %v1616_v25 = vmax.f32 %v1590_v0, 0.0 }
 0x197   : > { %v1211_v14 = vpop.f32.mrb[84].mxu0 }
 0x198   : > { %v1617_v26 = vmax.f32 %v1591_v12, 0.0  ;;  %v1266_v23 = vmax.f32 %v3638_v8, %v1211_v14  ;;  %v1504_v45 = vpop.f32.mrb[84].mxu1  ;;  %v2577_v24 = vpop.f32.mrb[85].mxu0 }
 0x199   : > { %v2633_v27 = vpop.f32.mrb[85].mxu1  ;;  %v1214_v46 = vpop.f32.mrb[86].mxu0 }
 0x19a   : > { %v2328_v28 = vpack.c.bf16 %v1617_v26, %v1616_v25  ;;  %v1559_v3 = vmax.f32 %v1266_v23, %v1504_v45  ;;  %v1267_v30 = vmax.f32 %v3639_v48, %v1214_v46  ;;  %v1507_v31 = vpop.f32.mrb[86].mxu1  ;;  %v2578_v50 = vpop.f32.mrb[87].mxu0  ;;  %v3644_v23 = vmax.f32 %v3342_v54, %v3344_v44 }
 0x19b   : > { %v2634_v51 = vpop.f32.mrb[87].mxu1 }
 0x19c   : > { %2361 = vst [vmem:[%s3386_s21 + $0x38] sm:$0xff] %v2328_v28   ;;  %v1592_v43 = vadd.f32 %v3372_v32, %v1559_v3  ;;  %v1560_v7 = vmax.f32 %v1267_v30, %v1507_v31  ;;  %v3645_v3 = vmax.f32 %v3348_v17, %v3350_v19 }
 0x19e   : > { %v1593_v37 = vadd.f32 %v3372_v32, %v1560_v7  ;;  %v1618_v15 = vmax.f32 %v1592_v43, 0.0 }
 0x19f   : > { %v1219_v39 = vpop.f32.mrb[88].mxu0 }
 0x1a0   : > { %v1619_v16 = vmax.f32 %v1593_v37, 0.0  ;;  %v1268_v5 = vmax.f32 %v3640_v60, %v1219_v39  ;;  %v1512_v6 = vpop.f32.mrb[88].mxu1  ;;  %v2581_v49 = vpop.f32.mrb[89].mxu0  ;;  %v3646_v39 = vld [vmem:[#allocation3_spill] sm:$0xff] }
 0x1a1   : > { %v2637_v52 = vpop.f32.mrb[89].mxu1  ;;  %v1222_v59 = vpop.f32.mrb[90].mxu0 }
 0x1a2   : > { %v2333_v62 = vpack.c.bf16 %v1619_v16, %v1618_v15  ;;  %v1561_v20 = vmax.f32 %v1268_v5, %v1512_v6  ;;  %v1269_v56 = vmax.f32 %v3641_v55, %v1222_v59  ;;  %v1515_v35 = vpop.f32.mrb[90].mxu1  ;;  %v2582_v36 = vpop.f32.mrb[91].mxu0  ;;  %v3647_v15 = vmax.f32 %v3354_v47, %v3646_v39  ;;  %v3648_v52 = vld [vmem:[#allocation4_spill] sm:$0xff]  ;;  %v3649_v59 = vld [vmem:[#allocation5_spill] sm:$0xff] }
 0x1a3   : > { %v2638_v21 = vpop.f32.mrb[91].mxu1 }
 0x1a4   : > { %2362 = vst [vmem:[%s3386_s21 + $0x40] sm:$0xff] %v2333_v62   ;;  %v1594_v58 = vadd.f32 %v3372_v32, %v1561_v20  ;;  %v1562_v13 = vmax.f32 %v1269_v56, %v1515_v35  ;;  %v3650_v62 = vmax.f32 %v3648_v52, %v3649_v59 }
 0x1a6   : > { %v1595_v4 = vadd.f32 %v3372_v32, %v1562_v13  ;;  %v1620_v63 = vmax.f32 %v1594_v58, 0.0 }
 0x1a7   : > { %v1227_v9 = vpop.f32.mrb[92].mxu0 }
 0x1a8   : > { %v1621_v1 = vmax.f32 %v1595_v4, 0.0  ;;  %v1270_v11 = vmax.f32 %v3642_v10, %v1227_v9  ;;  %v1520_v40 = vpop.f32.mrb[92].mxu1  ;;  %v2585_v34 = vpop.f32.mrb[93].mxu0 }
 0x1a9   : > { %v2641_v42 = vpop.f32.mrb[93].mxu1  ;;  %v1230_v41 = vpop.f32.mrb[94].mxu0 }
 0x1aa   : > { %v2338_v38 = vpack.c.bf16 %v1621_v1, %v1620_v63  ;;  %v1563_v18 = vmax.f32 %v1270_v11, %v1520_v40  ;;  %v1271_v33 = vmax.f32 %v3643_v53, %v1230_v41  ;;  %v1523_v0 = vpop.f32.mrb[94].mxu1  ;;  %v2586_v2 = vpop.f32.mrb[95].mxu0 }
 0x1ab   : > { %v2642_v12 = vpop.f32.mrb[95].mxu1 }
 0x1ac   : > { %2363 = vst [vmem:[%s3386_s21 + $0x48] sm:$0xff] %v2338_v38   ;;  %v1596_v14 = vadd.f32 %v3372_v32, %v1563_v18  ;;  %v1564_v25 = vmax.f32 %v1271_v33, %v1523_v0 }
 0x1ae   : > { %v1597_v57 = vadd.f32 %v3372_v32, %v1564_v25  ;;  %v1622_v26 = vmax.f32 %v1596_v14, 0.0 }
 0x1af   : > { %v1235_v61 = vpop.f32.mrb[96].mxu0 }
 0x1b0   : > { %v1623_v8 = vmax.f32 %v1597_v57, 0.0  ;;  %v1272_v45 = vmax.f32 %v3644_v23, %v1235_v61  ;;  %v1528_v24 = vpop.f32.mrb[96].mxu1  ;;  %v2589_v22 = vpop.f32.mrb[97].mxu0 }
 0x1b1   : > { %v2645_v29 = vpop.f32.mrb[97].mxu1  ;;  %v1238_v27 = vpop.f32.mrb[98].mxu0 }
 0x1b2   : > { %v2343_v46 = vpack.c.bf16 %v1623_v8, %v1622_v26  ;;  %v1565_v28 = vmax.f32 %v1272_v45, %v1528_v24  ;;  %v1273_v48 = vmax.f32 %v3645_v3, %v1238_v27  ;;  %v1531_v30 = vpop.f32.mrb[98].mxu1  ;;  %v2590_v31 = vpop.f32.mrb[99].mxu0 }
 0x1b3   : > { %v2646_v50 = vpop.f32.mrb[99].mxu1 }
 0x1b4   : > { %2364 = vst [vmem:[%s3386_s21 + $0x50] sm:$0xff] %v2343_v46   ;;  %v1598_v51 = vadd.f32 %v3372_v32, %v1565_v28  ;;  %v1566_v43 = vmax.f32 %v1273_v48, %v1531_v30 }
 0x1b6   : > { %v1599_v54 = vadd.f32 %v3372_v32, %v1566_v43  ;;  %v1624_v7 = vmax.f32 %v1598_v51, 0.0 }
 0x1b7   : > { %v1243_v44 = vpop.f32.mrb[100].mxu0 }
 0x1b8   : > { %v1625_v37 = vmax.f32 %v1599_v54, 0.0  ;;  %v1274_v16 = vmax.f32 %v3647_v15, %v1243_v44  ;;  %v1536_v60 = vpop.f32.mrb[100].mxu1  ;;  %v2593_v17 = vpop.f32.mrb[101].mxu0 }
 0x1b9   : > { %v2649_v19 = vpop.f32.mrb[101].mxu1  ;;  %v1246_v5 = vpop.f32.mrb[102].mxu0 }
 0x1ba   : > { %v2348_v6 = vpack.c.bf16 %v1625_v37, %v1624_v7  ;;  %v1567_v49 = vmax.f32 %v1274_v16, %v1536_v60  ;;  %v1275_v20 = vmax.f32 %v3650_v62, %v1246_v5  ;;  %v1539_v55 = vpop.f32.mrb[102].mxu1  ;;  %v2594_v56 = vpop.f32.mrb[103].mxu0 }
 0x1bb   : > { %v2650_v35 = vpop.f32.mrb[103].mxu1 }
 0x1bc   : > { %2365 = vst [vmem:[%s3386_s21 + $0x58] sm:$0xff] %v2348_v6   ;;  %v1600_v36 = vadd.f32 %v3372_v32, %v1567_v49  ;;  %v1568_v21 = vmax.f32 %v1275_v20, %v1539_v55 }
 0x1be   : > { %v1601_v47 = vadd.f32 %v3372_v32, %v1568_v21  ;;  %v1626_v58 = vmax.f32 %v1600_v36, 0.0  ;;  %1764 = sbr.rel (!%p2953_p4) target bundleno = 532 (0x214), region = 48 }
 0x1c0   : > { %v1627_v13 = vmax.f32 %v1601_v47, 0.0 }
 0x1c2   : > { %v2353_v4 = vpack.c.bf16 %v1627_v13, %v1626_v58 }
 0x1c4   : > { %2366 = vst [vmem:[%s3386_s21 + $0x60] sm:$0xff] %v2353_v4  }
 0x1c5   : > { %s3658_s12 = smov (!%p1767_p8, %s1766_s12), 26 }
 0x1c6   : > { %s2251_s17 = sshll.u32 %s3658_s12, 6 }
 0x1c7   : > { %p2254_p9 = scmp.eq.s32.totalorder %s2251_s17, 0 }
 0x1c8   : > { %2798 = sdivrem.u32 (!%p2254_p9), %s3658_s12, 26 }
 0x1c9   : > { %1775 = sbr.rel (%p2254_p9) target bundleno = 532 (0x214), region = 52 }
 0x1d1   : > { %s3504_s29 = spop.drf %2798 }
 0x1d2   : > { %p2255_p10 = scmp.le.s32.totalorder %s3504_s29, 0 }
 0x1d3   : > { %s3651_s24 = smov (!%p2255_p10), %s3498_s16  ;;  %s3652_s10 = smov (!%p2255_p10), %s3386_s21 }
 0x1d4   : > { %2048 = sbr.rel (%p2255_p10) target bundleno = 503 (0x1f7), region = 133  ;;  %s3513_s18 = smov (!%p2255_p10), 0  }
 0x1d5   : > { %s3515_s19 = smov (!%p2255_p10), 0  }
 0x1db LB: >> { %v1792_v32 = vld [vmem:[%s2864_s10] sm:$0xf]  ;;  %v1794_v9 = vld [vmem:[%s2864_s10 + $0x4] sm:$0xf]  ;;  %v1796_v63 = vld [vmem:[%s2864_s10 + $0x8] sm:$0xf]  ;;  %s2872_s19 = sphi %s3515_s19, %s1786_s19   ;;  %s2868_s18 = sphi %s3513_s18, %s3653_s18   ;;  %s2864_s10 = sphi %s3652_s10, %s1849_s10   ;;  %s2860_s24 = sphi %s3651_s24, %s1850_s24  }
 0x1dc   : >> { %1793 = vst [vmem:[%s2860_s24] sm:$0xf] %v1792_v32  ;;  %1795 = vst [vmem:[%s2860_s24 + $0x4] sm:$0xf] %v1794_v9  ;;  %v1798_v1 = vld [vmem:[%s2864_s10 + $0xc] sm:$0xf]  ;;  %s1844_s20 = sadd.s32 1, %s2868_s18 }
 0x1dd   : >> { %1797 = vst [vmem:[%s2860_s24 + $0x8] sm:$0xf] %v1796_v63  ;;  %v1800_v10 = vld [vmem:[%s2864_s10 + $0x10] sm:$0xf]  ;;  %v1802_v11 = vld [vmem:[%s2864_s10 + $0x14] sm:$0xf]  ;;  %p1845_p11 = scmp.ge.s32.totalorder %s1844_s20, %s3504_s29 }
 0x1de   : >> { %1799 = vst [vmem:[%s2860_s24 + $0xc] sm:$0xf] %v1798_v1  ;;  %1801 = vst [vmem:[%s2860_s24 + $0x10] sm:$0xf] %v1800_v10  ;;  %v1804_v40 = vld [vmem:[%s2864_s10 + $0x18] sm:$0xf] }
 0x1df   : >> { %1803 = vst [vmem:[%s2860_s24 + $0x14] sm:$0xf] %v1802_v11  ;;  %v1806_v34 = vld [vmem:[%s2864_s10 + $0x1c] sm:$0xf]  ;;  %v1808_v42 = vld [vmem:[%s2864_s10 + $0x20] sm:$0xf] }
 0x1e0   : >> { %1805 = vst [vmem:[%s2860_s24 + $0x18] sm:$0xf] %v1804_v40  ;;  %1807 = vst [vmem:[%s2860_s24 + $0x1c] sm:$0xf] %v1806_v34  ;;  %v1810_v41 = vld [vmem:[%s2864_s10 + $0x24] sm:$0xf] }
 0x1e1   : >> { %1809 = vst [vmem:[%s2860_s24 + $0x20] sm:$0xf] %v1808_v42  ;;  %v1812_v38 = vld [vmem:[%s2864_s10 + $0x28] sm:$0xf]  ;;  %v1814_v18 = vld [vmem:[%s2864_s10 + $0x2c] sm:$0xf] }
 0x1e2   : >> { %1811 = vst [vmem:[%s2860_s24 + $0x24] sm:$0xf] %v1810_v41  ;;  %1813 = vst [vmem:[%s2860_s24 + $0x28] sm:$0xf] %v1812_v38  ;;  %v1816_v53 = vld [vmem:[%s2864_s10 + $0x30] sm:$0xf] }
 0x1e3   : >> { %1815 = vst [vmem:[%s2860_s24 + $0x2c] sm:$0xf] %v1814_v18  ;;  %v1818_v33 = vld [vmem:[%s2864_s10 + $0x34] sm:$0xf]  ;;  %v1820_v0 = vld [vmem:[%s2864_s10 + $0x38] sm:$0xf] }
 0x1e4   : >> { %1817 = vst [vmem:[%s2860_s24 + $0x30] sm:$0xf] %v1816_v53  ;;  %1819 = vst [vmem:[%s2860_s24 + $0x34] sm:$0xf] %v1818_v33  ;;  %v1822_v2 = vld [vmem:[%s2864_s10 + $0x3c] sm:$0xf] }
 0x1e5   : >> { %1821 = vst [vmem:[%s2860_s24 + $0x38] sm:$0xf] %v1820_v0  ;;  %v1824_v12 = vld [vmem:[%s2864_s10 + $0x40] sm:$0xf]  ;;  %v1826_v14 = vld [vmem:[%s2864_s10 + $0x44] sm:$0xf] }
 0x1e6   : >> { %1823 = vst [vmem:[%s2860_s24 + $0x3c] sm:$0xf] %v1822_v2  ;;  %1825 = vst [vmem:[%s2860_s24 + $0x40] sm:$0xf] %v1824_v12  ;;  %v1828_v25 = vld [vmem:[%s2864_s10 + $0x48] sm:$0xf] }
 0x1e7   : >> { %1827 = vst [vmem:[%s2860_s24 + $0x44] sm:$0xf] %v1826_v14  ;;  %v1830_v57 = vld [vmem:[%s2864_s10 + $0x4c] sm:$0xf]  ;;  %v1832_v61 = vld [vmem:[%s2864_s10 + $0x50] sm:$0xf] }
 0x1e8   : >> { %1829 = vst [vmem:[%s2860_s24 + $0x48] sm:$0xf] %v1828_v25  ;;  %1831 = vst [vmem:[%s2860_s24 + $0x4c] sm:$0xf] %v1830_v57  ;;  %v1834_v26 = vld [vmem:[%s2864_s10 + $0x54] sm:$0xf] }
 0x1e9   : >> { %1833 = vst [vmem:[%s2860_s24 + $0x50] sm:$0xf] %v1832_v61  ;;  %v1836_v8 = vld [vmem:[%s2864_s10 + $0x58] sm:$0xf]  ;;  %v1838_v23 = vld [vmem:[%s2864_s10 + $0x5c] sm:$0xf] }
 0x1ea   : >> { %1835 = vst [vmem:[%s2860_s24 + $0x54] sm:$0xf] %v1834_v26  ;;  %1837 = vst [vmem:[%s2860_s24 + $0x58] sm:$0xf] %v1836_v8  ;;  %v1840_v45 = vld [vmem:[%s2864_s10 + $0x60] sm:$0xf] }
 0x1eb   : >> { %1839 = vst [vmem:[%s2860_s24 + $0x5c] sm:$0xf] %v1838_v23  ;;  %v1842_v24 = vld [vmem:[%s2864_s10 + $0x64] sm:$0xf]  ;;  %1841 = vst [vmem:[%s2860_s24 + $0x60] sm:$0xf] %v1840_v45 }
 0x1ec   : >> { %1843 = vst [vmem:[%s2860_s24 + $0x64] sm:$0xf] %v1842_v24  ;;  %s3660_s20 = smov (%p1845_p11, %s1844_s20), 0  ;;  %s1786_s19 = sadd.s32 1, %s2872_s19  }
 0x1ed   : >> { %s1847_s23 = smul.u32 104, %s3660_s20  ;;  %p1785_p12 = scmp.ge.s32.totalorder %s1786_s19, %s3504_s29 }
 0x1ee   : >> { %s3653_s18 = smov %s3660_s20 }
 0x1ef   : >> { %s1849_s10 = scalar_lea.vmem %s3386_s21, %s1847_s23 [#allocation2]   ;;  %s1850_s24 = scalar_lea.vmem %s3498_s16, %s1847_s23  }
 0x1f0   : > { %1788 = sbr.rel (!%p1785_p12) target bundleno = 475 (0x1db), region = 139 }
 0x1f7 PF: > { %2800 = sdivrem.u32 %s3658_s12, 26 }
 0x1f8   : > { %s2256_s26 = smul.u32 104, %s3504_s29 }
 0x1fa   : > { %s1855_s27 = scalar_lea.vmem %s3386_s21, %s2256_s26 [#allocation2]   ;;  %s1857_s30 = scalar_lea.vmem %s3498_s16, %s2256_s26  }
 0x200   : > { %s2801_s7 = spop.drf %2800 }
 0x201   : > { %p2258_p13 = scmp.le.s32.totalorder %s2801_s7, 0 }
 0x202   : > { %s2874_s8 = smov (!%p2258_p13), %s1857_s30   ;;  %s2878_s9 = smov (!%p2258_p13), %s1855_s27  }
 0x203   : > { %2062 = sbr.rel (%p2258_p13) target bundleno = 532 (0x214), region = 144  ;;  %s2882_s11 = smov (!%p2258_p13), 0  }
 0x204   : > { %s2886_s13 = smov (!%p2258_p13), 0  }
 0x20a LB: >> { %v1867_v22 = vld [vmem:[%s2880_s9] sm:$0xf]  ;;  %s1869_s14 = sadd.s32 1, %s2884_s11  ;;  %s1861_s13 = sadd.s32 1, %s2888_s13   ;;  %s2888_s13 = sphi %s2886_s13, %s1861_s13   ;;  %s2884_s11 = sphi %s2882_s11, %s2883_s11   ;;  %s2880_s9 = sphi %s2878_s9, %s1874_s9   ;;  %s2876_s8 = sphi %s2874_s8, %s1875_s8  }
 0x20b   : >> { %1868 = vst [vmem:[%s2876_s8] sm:$0xf] %v1867_v22  ;;  %p1870_p0 = scmp.ge.s32.totalorder %s1869_s14, %s2801_s7  ;;  %p1860_p1 = scmp.ge.s32.totalorder %s1861_s13, %s2801_s7 }
 0x20d   : >> { %s3662_s14 = smov (%p1870_p0, %s1869_s14), 0  ;;  %1863 = sbr.rel (!%p1860_p1) target bundleno = 522 (0x20a), region = 150 }
 0x20e   : >> { %s2259_s21 = sshll.u32 %s3662_s14, 2  ;;  %s2883_s11 = smov %s3662_s14  }
 0x20f   : >> { %s1874_s9 = scalar_lea.vmem %s1855_s27, %s2259_s21 [#allocation2]   ;;  %s1875_s8 = scalar_lea.vmem %s1857_s30, %s2259_s21  }
 0x214 PF: > { %p13_p2 = scmp.ge.s32.totalorder %s2943_s25, 4   ;;  %s3654_s21 = smov %s2852_s22 }
 0x215   : > { %s3655_s22 = smov %s2951_s28  ;;  %s3656_s23 = smov %s2943_s25 }
 0x216   :  { %15 = sbr.rel (!%p13_p2) target bundleno = 2 (0x2), region = 161 }

// kernel: cnn_forward.4
= control target key start
LH: loop header
LB: loop body
LE: loop exit
PB: predicated region body
PF: predicated region fallthrough
CT: control target
= control target key end

     0   :  { %s2614_s21 = smov 0   ;;  %s2616_s22 = smov 0   ;;  %s3168_s0 = inlined_call_operand.vmem [shape: bf16[98,400], index: 0, kind: input, shape index: {}]   ;;  %s3169_s1 = inlined_call_operand.vmem [shape: bf16[98,400], index: 1, kind: input, shape index: {}]   ;;  %s3170_s2 = inlined_call_operand.vmem [shape: bf16[98,400], index: 2, kind: input, shape index: {}]   ;;  %s3171_s3 = inlined_call_operand.vmem [shape: bf16[98,400], index: 3, kind: input, shape index: {}]   ;;  %s3172_s4 = inlined_call_operand.vmem [shape: bf16[400,128], index: 4, kind: input, shape index: {}]   ;;  %s3173_s5 = inlined_call_operand.vmem [shape: f32[1,128], index: 5, kind: input, shape index: {}]   ;;  %s3174_s6 = inlined_call_operand.vmem [shape: bf16[98,128], index: 6, kind: output, shape index: {}]  }
   0x1   :  { %s2618_s23 = smov 0  }
   0x2 LB: > { %s2627_s24 = sadd.s32 4294967295, %s2544_s23   ;;  %s2629_s25 = sadd.s32 1, %s2544_s23   ;;  %s2544_s23 = sphi %s2618_s23, %s3181_s23   ;;  %s2540_s22 = sphi %s2616_s22, %s3180_s22   ;;  %s2536_s21 = sphi %s2614_s21, %s3179_s21  }
   0x3   : > { %s166_s26 = ssub.s32 %s2544_s23, %s2629_s25  ;;  %s169_s27 = sadd.s32 1, %s2540_s22 }
   0x4   : > { %p167_p0 = scmp.eq.s32.totalorder %s166_s26, 0  ;;  %p179_p1 = scmp.ne.s32.totalorder %s2540_s22, %s2536_s21 }
   0x5   : > { %p180_p2 = scmp.eq.s32.totalorder %s2627_s24, 1  ;;  %p1937_p3 = scmp.ge.s32.totalorder %s2544_s23, 1 }
   0x6   : > { %s2637_s28 = scalar_select %p167_p0, %s2540_s22, %s169_s27  }
   0x7   : > { %p2639_p4 = por %p180_p2, %p179_p1  ;;  %p290_p5 = scmp.lt.s32.totalorder %s2544_s23, 3 }
   0x9   : > { %p291_p6 = pnand %p1937_p3, %p290_p5 }
   0xa   : > { %v2646_v0 = vld [vmem:[%s3172_s4 + $0x40] sm:$0xff] (!%p291_p6)   ;;  %v2578_v1 = vmov (!%p291_p6), 0   ;;  %v2664_v4 = vld [vmem:[%s3172_s4 + $0x48] sm:$0xff] (!%p291_p6)   ;;  %v2682_v7 = vld [vmem:[%s3172_s4 + $0x50] sm:$0xff] (!%p291_p6)   ;;  %s2698_s30 = sshll.u32 (!%p291_p6), %s2627_s24, 3  ;;  %vm724_vm0 = vcmask (!%p291_p6), 130048  }
   0xb   : > { %294 = sbr.rel (%p291_p6) target bundleno = 458 (0x1ca), region = 44  ;;  %802 = vmatprep.subr.bf16.mxu1 (!%p291_p6), %v2578_v1  ;;  %v2652_v2 = vld [vmem:[%s3172_s4 + $0x80] sm:$0xff] (!%p291_p6)   ;;  %2120 = vmatprep.subr.bf16.mxu0 (!%p291_p6), %v2646_v0  ;;  %v2671_v5 = vld [vmem:[%s3172_s4 + $0x88] sm:$0xff] (!%p291_p6)   ;;  %v2688_v8 = vld [vmem:[%s3172_s4 + $0x90] sm:$0xff] (!%p291_p6)   ;;  %p364_p7 = scmp.lt.s32.totalorder (!%p291_p6), %s2698_s30, 12 }
   0xc   : > { %v2658_v3 = vld [vmem:[%s3172_s4] sm:$0xff] (!%p291_p6)   ;;  %803 = vmatpush1.bf16.msra.mxu1 (!%p291_p6), %v2652_v2  ;;  %v2677_v6 = vld [vmem:[%s3172_s4 + $0x8] sm:$0xff] (!%p291_p6)   ;;  %v2695_v9 = vld [vmem:[%s3172_s4 + $0x10] sm:$0xff] (!%p291_p6)   ;;  %s355_s23 = sand.u32 (!%p291_p6), 1, %s2536_s21  }
   0xd   : > { %2121 = vmatpush3.bf16.msra.mxu0 (!%p291_p6), %v2658_v3  ;;  %804 = vmatprep.subr.bf16.mxu1 (!%p291_p6), %v2578_v1  ;;  %v2704_v10 = vld [vmem:[%s3172_s4 + $0x58] sm:$0xff] (!%p291_p6)   ;;  %v2724_v13 = vld [vmem:[%s3172_s4 + $0x60] sm:$0xff] (!%p291_p6)   ;;  %v2744_v16 = vld [vmem:[%s3172_s4 + $0x68] sm:$0xff] (!%p291_p6)   ;;  %s1938_s26 = sshll.u32 (!%p291_p6), %s355_s23, 5 }
   0xe   : > { %2122 = vmatprep.subr.bf16.mxu0 (!%p291_p6), %v2664_v4  ;;  %v2710_v11 = vld [vmem:[%s3172_s4 + $0x98] sm:$0xff] (!%p291_p6)   ;;  %v2730_v14 = vld [vmem:[%s3172_s4 + $0xa0] sm:$0xff] (!%p291_p6)   ;;  %v2750_v17 = vld [vmem:[%s3172_s4 + $0xa8] sm:$0xff] (!%p291_p6)   ;;  %s3090_s21 = scalar_lea.vmem (!%p291_p6), [#allocation2], %s1938_s26  }
   0xf   : > { %v2718_v12 = vld [vmem:[%s3172_s4 + $0x18] sm:$0xff] (!%p291_p6)   ;;  %v2738_v15 = vld [vmem:[%s3172_s4 + $0x20] sm:$0xff] (!%p291_p6)   ;;  %v2759_v18 = vld [vmem:[%s3172_s4 + $0x28] sm:$0xff] (!%p291_p6)  }
  0x10   : > { %805 = vmatpush1.bf16.msra.mxu1 (!%p291_p6), %v2671_v5  ;;  %v2765_v19 = vld [vmem:[%s3172_s4 + $0x70] sm:$0xff] (!%p291_p6)   ;;  %v2789_v22 = vld [vmem:[%s3172_s4 + $0x78] sm:$0xff] (!%p291_p6)   ;;  %v2814_v28 = vld [vmem:[%s3172_s4 + $0xc0] sm:$0xff] (!%p291_p6)  }
  0x11   : > { %2123 = vmatpush3.bf16.msra.mxu0 (!%p291_p6), %v2677_v6  ;;  %806 = vmatprep.subr.bf16.mxu1 (!%p291_p6), %v2578_v1  ;;  %v2770_v20 = vld [vmem:[%s3172_s4 + $0xb0] sm:$0xff] (!%p291_p6)   ;;  %v2797_v24 = vld [vmem:[%s3172_s4 + $0xb8] sm:$0xff] (!%p291_p6)  }
  0x12   : > { %2124 = vmatprep.subr.bf16.mxu0 %v2682_v7  ;;  %s365_s17 = scalar_select %p364_p7, %s2698_s30, 12  ;;  %v2782_v21 = vld [vmem:[%s3172_s4 + $0x30] sm:$0xff]   ;;  %v2805_v26 = vld [vmem:[%s3172_s4 + $0x38] sm:$0xff]  }
  0x13   : > { %s1664_s27 = ssub.s32 (%p2639_p4), 13, %s2698_s30  ;;  %s2094_s8 = sshll.u32 (%p2639_p4), %s2627_s24, 5 }
  0x14   : > { %807 = vmatpush1.bf16.msra.mxu1 %v2688_v8  ;;  %s2752_s7 = sshll.u32 %s365_s17, 4  ;;  %p1665_p8 = scmp.lt.s32.totalorder (%p2639_p4), %s1664_s27, 8 }
  0x15   : > { %2125 = vmatpush3.bf16.msra.mxu0 %v2695_v9  ;;  %808 = vmatprep.subr.bf16.mxu1 %v2578_v1  ;;  %s2776_s16 = scalar_lea.vmem %s3168_s0, %s2752_s7  ;;  %s2825_s13 = scalar_lea.vmem %s3169_s1, %s2752_s7 }
  0x16   : > { %2126 = vmatprep.subr.bf16.mxu0 %v2704_v10  ;;  %v2395_v23 = vld [vmem:[%s2776_s16 + $0x4] ss:$16 sps:$4 sm:$0xff]   ;;  %v2399_v25 = vld [vmem:[%s2776_s16 + $0xc] ss:$16 sps:$4 sm:$0xff]   ;;  %v2393_v27 = vld [vmem:[%s2776_s16] ss:$16 sps:$4 sm:$0xff]   ;;  %s2849_s17 = scalar_lea.vmem %s3170_s2, %s2752_s7  ;;  %s2873_s20 = scalar_lea.vmem %s3171_s3, %s2752_s7 }
  0x17   : > { %769 = vmatprep.mubr.bf16.mxu0 %v2395_v23  ;;  %1992 = vmatprep.mubr.msk.bf16.mxu1 %vm724_vm0, %v2399_v25  ;;  %v2400_v29 = vld [vmem:[%s2776_s16 + $0x24] ss:$16 sps:$4 sm:$0xff]   ;;  %v2397_v30 = vld [vmem:[%s2776_s16 + $0x8] ss:$16 sps:$4 sm:$0xff]   ;;  %v2403_v31 = vld [vmem:[%s2776_s16 + $0x2c] ss:$16 sps:$4 sm:$0xff]   ;;  %s3114_s11 = scalar_lea.vmem (%p2639_p4), %s3174_s6, %s2094_s8  }
  0x18   : > { %809 = vmatpush1.bf16.msra.mxu1 %v2710_v11  ;;  %v2402_v32 = vld [vmem:[%s2776_s16 + $0x20] ss:$16 sps:$4 sm:$0xff]   ;;  %v2406_v33 = vld [vmem:[%s2776_s16 + $0x44] ss:$16 sps:$4 sm:$0xff]   ;;  %v2405_v34 = vld [vmem:[%s2776_s16 + $0x28] ss:$16 sps:$4 sm:$0xff]  }
  0x19   : > { %2127 = vmatpush3.bf16.msra.mxu0 %v2718_v12  ;;  %810 = vmatprep.subr.bf16.mxu1 %v2578_v1  ;;  %v2409_v35 = vld [vmem:[%s2776_s16 + $0x4c] ss:$16 sps:$4 sm:$0xff]   ;;  %v2408_v36 = vld [vmem:[%s2776_s16 + $0x40] ss:$16 sps:$4 sm:$0xff]   ;;  %v2412_v37 = vld [vmem:[%s2776_s16 + $0x64] ss:$16 sps:$4 sm:$0xff]  }
  0x1a   : > { %2128 = vmatprep.subr.bf16.mxu0 %v2724_v13  ;;  %v2411_v38 = vld [vmem:[%s2776_s16 + $0x48] ss:$16 sps:$4 sm:$0xff]   ;;  %v2415_v39 = vld [vmem:[%s2776_s16 + $0x6c] ss:$16 sps:$4 sm:$0xff]   ;;  %v2414_v40 = vld [vmem:[%s2776_s16 + $0x60] ss:$16 sps:$4 sm:$0xff]  }
  0x1b   : > { %v2420_v41 = vld [vmem:[%s2825_s13 + $0x4] ss:$16 sps:$4 sm:$0xff]   ;;  %v2417_v42 = vld [vmem:[%s2776_s16 + $0x68] ss:$16 sps:$4 sm:$0xff]   ;;  %v2423_v43 = vld [vmem:[%s2825_s13 + $0xc] ss:$16 sps:$4 sm:$0xff]  }
  0x1c   : > { %811 = vmatpush1.bf16.msra.mxu1 %v2730_v14  ;;  %v2418_v44 = vld [vmem:[%s2825_s13] ss:$16 sps:$4 sm:$0xff]   ;;  %v2424_v45 = vld [vmem:[%s2825_s13 + $0x24] ss:$16 sps:$4 sm:$0xff]   ;;  %v2421_v46 = vld [vmem:[%s2825_s13 + $0x8] ss:$16 sps:$4 sm:$0xff]  }
  0x1d   : > { %2129 = vmatpush3.bf16.msra.mxu0 %v2738_v15  ;;  %812 = vmatprep.subr.bf16.mxu1 %v2578_v1  ;;  %v2426_v47 = vld [vmem:[%s2825_s13 + $0x20] ss:$16 sps:$4 sm:$0xff]   ;;  %v2427_v48 = vld [vmem:[%s2825_s13 + $0x2c] ss:$16 sps:$4 sm:$0xff]   ;;  %v2430_v49 = vld [vmem:[%s2825_s13 + $0x44] ss:$16 sps:$4 sm:$0xff]  }
  0x1e   : > { %2130 = vmatprep.subr.bf16.mxu0 %v2744_v16  ;;  %v2429_v50 = vld [vmem:[%s2825_s13 + $0x28] ss:$16 sps:$4 sm:$0xff]   ;;  %v2432_v51 = vld [vmem:[%s2825_s13 + $0x40] ss:$16 sps:$4 sm:$0xff]   ;;  %v2433_v52 = vld [vmem:[%s2825_s13 + $0x4c] ss:$16 sps:$4 sm:$0xff]  }
  0x1f   : > { %v2436_v53 = vld [vmem:[%s2825_s13 + $0x64] ss:$16 sps:$4 sm:$0xff]   ;;  %v2435_v54 = vld [vmem:[%s2825_s13 + $0x48] ss:$16 sps:$4 sm:$0xff]   ;;  %v2438_v55 = vld [vmem:[%s2825_s13 + $0x60] ss:$16 sps:$4 sm:$0xff]  }
  0x20   : > { %813 = vmatpush1.bf16.msra.mxu1 %v2750_v17  ;;  %v2439_v56 = vld [vmem:[%s2825_s13 + $0x6c] ss:$16 sps:$4 sm:$0xff]   ;;  %v2444_v57 = vld [vmem:[%s2849_s17 + $0x4] ss:$16 sps:$4 sm:$0xff]   ;;  %v2441_v58 = vld [vmem:[%s2825_s13 + $0x68] ss:$16 sps:$4 sm:$0xff]  }
  0x21   : > { %2131 = vmatpush3.bf16.msra.mxu0 %v2759_v18  ;;  %814 = vmatprep.subr.bf16.mxu1 %v2578_v1  ;;  %v2447_v59 = vld [vmem:[%s2849_s17 + $0xc] ss:$16 sps:$4 sm:$0xff]   ;;  %v2442_v60 = vld [vmem:[%s2849_s17] ss:$16 sps:$4 sm:$0xff]   ;;  %v2448_v61 = vld [vmem:[%s2849_s17 + $0x24] ss:$16 sps:$4 sm:$0xff]  }
  0x22   : > { %2132 = vmatprep.subr.bf16.mxu0 %v2765_v19  ;;  %v2450_v62 = vld [vmem:[%s2849_s17 + $0x20] ss:$16 sps:$4 sm:$0xff]   ;;  %v2454_v63 = vld [vmem:[%s2849_s17 + $0x44] ss:$16 sps:$4 sm:$0xff]   ;;  %v2489_v25 = vld [vmem:[%s2873_s20 + $0x68] ss:$16 sps:$4 sm:$0xff]  }
  0x23   : > { %v2486_v23 = vld [vmem:[%s2873_s20 + $0x60] ss:$16 sps:$4 sm:$0xff]  }
  0x24   : > { %815 = vmatpush1.bf16.msra.mxu1 %v2770_v20 }
  0x25   : > { %2133 = vmatpush3.bf16.msra.mxu0 %v2782_v21  ;;  %816 = vmatprep.subr.bf16.mxu1 %v2578_v1 }
  0x26   : > { %2134 = vmatprep.subr.bf16.mxu0 %v2789_v22 }
  0x28   : > { %817 = vmatpush1.bf16.msra.mxu1 %v2797_v24 }
  0x29   : > { %2135 = vmatpush3.bf16.msra.mxu0 %v2805_v26  ;;  %818 = vmatprep.subr.bf16.mxu1 %v2578_v1 }
  0x2a   : > { %2160 = vmatprep.subr.bf16.mxu0 %v2646_v0 }
  0x2c   : > { %770 = vmatmul.mubr.bf16.vlgmr.msra.gmra.mrb[0].mxu0 %v2393_v27  ;;  %819 = vmatpush1.bf16.msra.mxu1 %v2814_v28 }
  0x2d   : > { %1036 = vmatprep.subr.bf16.mxu1 %v2578_v1  ;;  %2161 = vmatpush3.bf16.msra.mxu0 %v2658_v3 }
  0x2e   : > { %2162 = vmatprep.subr.bf16.mxu0 %v2664_v4  ;;  %777 = vmatprep.mubr.bf16.mxu0 %v2400_v29 }
  0x2f   : > { %835 = vmatmul.mubr.bf16.vlgmr.msra.gmra.mrb[0].mxu1 %v2397_v30 }
  0x30   : > { %1037 = vmatpush1.bf16.msra.mxu1 %v2652_v2  ;;  %1993 = vmatprep.mubr.msk.bf16.mxu1 %vm724_vm0, %v2403_v31 }
  0x31   : > { %1038 = vmatprep.subr.bf16.mxu1 %v2578_v1  ;;  %2163 = vmatpush3.bf16.msra.mxu0 %v2677_v6 }
  0x32   : > { %2164 = vmatprep.subr.bf16.mxu0 %v2682_v7 }
  0x34   : > { %1039 = vmatpush1.bf16.msra.mxu1 %v2671_v5  ;;  %778 = vmatmul.mubr.bf16.gmra.mrb[4].mxu0 %v2402_v32 }
  0x35   : > { %1040 = vmatprep.subr.bf16.mxu1 %v2578_v1  ;;  %2165 = vmatpush3.bf16.msra.mxu0 %v2695_v9 }
  0x36   : > { %2166 = vmatprep.subr.bf16.mxu0 %v2704_v10  ;;  %785 = vmatprep.mubr.bf16.mxu0 %v2406_v33 }
  0x37   : > { %843 = vmatmul.mubr.bf16.gmra.mrb[4].mxu1 %v2405_v34 }
  0x38   : > { %1041 = vmatpush1.bf16.msra.mxu1 %v2688_v8  ;;  %1994 = vmatprep.mubr.msk.bf16.mxu1 %vm724_vm0, %v2409_v35 }
  0x39   : > { %1042 = vmatprep.subr.bf16.mxu1 %v2578_v1  ;;  %2167 = vmatpush3.bf16.msra.mxu0 %v2718_v12 }
  0x3a   : > { %2168 = vmatprep.subr.bf16.mxu0 %v2724_v13 }
  0x3c   : > { %1043 = vmatpush1.bf16.msra.mxu1 %v2710_v11  ;;  %786 = vmatmul.mubr.bf16.gmra.mrb[8].mxu0 %v2408_v36 }
  0x3d   : > { %1044 = vmatprep.subr.bf16.mxu1 %v2578_v1  ;;  %2169 = vmatpush3.bf16.msra.mxu0 %v2738_v15 }
  0x3e   : > { %2170 = vmatprep.subr.bf16.mxu0 %v2744_v16  ;;  %793 = vmatprep.mubr.bf16.mxu0 %v2412_v37 }
  0x3f   : > { %851 = vmatmul.mubr.bf16.gmra.mrb[8].mxu1 %v2411_v38 }
  0x40   : > { %1045 = vmatpush1.bf16.msra.mxu1 %v2730_v14  ;;  %1995 = vmatprep.mubr.msk.bf16.mxu1 %vm724_vm0, %v2415_v39 }
  0x41   : > { %1046 = vmatprep.subr.bf16.mxu1 %v2578_v1  ;;  %2171 = vmatpush3.bf16.msra.mxu0 %v2759_v18 }
  0x42   : > { %2172 = vmatprep.subr.bf16.mxu0 %v2765_v19 }
  0x44   : > { %1047 = vmatpush1.bf16.msra.mxu1 %v2750_v17  ;;  %794 = vmatmul.mubr.bf16.gmra.mrb[12].mxu0 %v2414_v40 }
  0x45   : > { %1048 = vmatprep.subr.bf16.mxu1 %v2578_v1  ;;  %2173 = vmatpush3.bf16.msra.mxu0 %v2782_v21 }
  0x46   : > { %2174 = vmatprep.subr.bf16.mxu0 %v2789_v22  ;;  %1003 = vmatprep.mubr.bf16.mxu0 %v2420_v41 }
  0x47   : > { %859 = vmatmul.mubr.bf16.gmra.mrb[12].mxu1 %v2417_v42 }
  0x48   : > { %1049 = vmatpush1.bf16.msra.mxu1 %v2770_v20  ;;  %2012 = vmatprep.mubr.msk.bf16.mxu1 %vm724_vm0, %v2423_v43 }
  0x49   : > { %1050 = vmatprep.subr.bf16.mxu1 %v2578_v1  ;;  %2175 = vmatpush3.bf16.msra.mxu0 %v2805_v26 }
  0x4a   : > { %2200 = vmatprep.subr.bf16.mxu0 %v2646_v0 }
  0x4c   : > { %1051 = vmatpush1.bf16.msra.mxu1 %v2797_v24  ;;  %1004 = vmatmul.mubr.bf16.vlgmr.msra.gmra.mrb[16].mxu0 %v2418_v44 }
  0x4d   : > { %1052 = vmatprep.subr.bf16.mxu1 %v2578_v1  ;;  %2201 = vmatpush3.bf16.msra.mxu0 %v2658_v3 }
  0x4e   : > { %1011 = vmatprep.mubr.bf16.mxu0 %v2424_v45  ;;  %2202 = vmatprep.subr.bf16.mxu0 %v2664_v4 }
  0x50   : > { %1053 = vmatpush1.bf16.msra.mxu1 %v2814_v28 }
  0x51   : > { %1278 = vmatprep.subr.bf16.mxu1 %v2578_v1  ;;  %2203 = vmatpush3.bf16.msra.mxu0 %v2677_v6 }
  0x52   : > { %2204 = vmatprep.subr.bf16.mxu0 %v2682_v7 }
  0x53   : > { %1069 = vmatmul.mubr.bf16.vlgmr.msra.gmra.mrb[16].mxu1 %v2421_v46 }
  0x54   : > { %1279 = vmatpush1.bf16.msra.mxu1 %v2652_v2  ;;  %1012 = vmatmul.mubr.bf16.gmra.mrb[20].mxu0 %v2426_v47 }
  0x55   : > { %1280 = vmatprep.subr.bf16.mxu1 %v2578_v1  ;;  %2013 = vmatprep.mubr.msk.bf16.mxu1 %vm724_vm0, %v2427_v48 }
  0x56   : > { %2205 = vmatpush3.bf16.msra.mxu0 %v2695_v9  ;;  %1019 = vmatprep.mubr.bf16.mxu0 %v2430_v49 }
  0x57   : > { %2206 = vmatprep.subr.bf16.mxu0 %v2704_v10 }
  0x58   : > { %1281 = vmatpush1.bf16.msra.mxu1 %v2671_v5 }
  0x59   : > { %1282 = vmatprep.subr.bf16.mxu1 %v2578_v1 }
  0x5a   : > { %2207 = vmatpush3.bf16.msra.mxu0 %v2718_v12 }
  0x5b   : > { %1077 = vmatmul.mubr.bf16.gmra.mrb[20].mxu1 %v2429_v50  ;;  %2208 = vmatprep.subr.bf16.mxu0 %v2724_v13 }
  0x5c   : > { %1283 = vmatpush1.bf16.msra.mxu1 %v2688_v8  ;;  %1020 = vmatmul.mubr.bf16.gmra.mrb[24].mxu0 %v2432_v51 }
  0x5d   : > { %1284 = vmatprep.subr.bf16.mxu1 %v2578_v1  ;;  %2014 = vmatprep.mubr.msk.bf16.mxu1 %vm724_vm0, %v2433_v52 }
  0x5e   : > { %2209 = vmatpush3.bf16.msra.mxu0 %v2738_v15  ;;  %1027 = vmatprep.mubr.bf16.mxu0 %v2436_v53 }
  0x5f   : > { %2210 = vmatprep.subr.bf16.mxu0 %v2744_v16 }
  0x60   : > { %1285 = vmatpush1.bf16.msra.mxu1 %v2710_v11 }
  0x61   : > { %1286 = vmatprep.subr.bf16.mxu1 %v2578_v1 }
  0x62   : > { %2211 = vmatpush3.bf16.msra.mxu0 %v2759_v18 }
  0x63   : > { %1085 = vmatmul.mubr.bf16.gmra.mrb[24].mxu1 %v2435_v54  ;;  %2212 = vmatprep.subr.bf16.mxu0 %v2765_v19 }
  0x64   : > { %1287 = vmatpush1.bf16.msra.mxu1 %v2730_v14  ;;  %1028 = vmatmul.mubr.bf16.gmra.mrb[28].mxu0 %v2438_v55 }
  0x65   : > { %1288 = vmatprep.subr.bf16.mxu1 %v2578_v1  ;;  %2015 = vmatprep.mubr.msk.bf16.mxu1 %vm724_vm0, %v2439_v56 }
  0x66   : > { %2213 = vmatpush3.bf16.msra.mxu0 %v2782_v21  ;;  %1245 = vmatprep.mubr.bf16.mxu0 %v2444_v57 }
  0x67   : > { %2214 = vmatprep.subr.bf16.mxu0 %v2789_v22 }
  0x68   : > { %1289 = vmatpush1.bf16.msra.mxu1 %v2750_v17 }
  0x69   : > { %1290 = vmatprep.subr.bf16.mxu1 %v2578_v1 }
  0x6a   : > { %2215 = vmatpush3.bf16.msra.mxu0 %v2805_v26 }
  0x6b   : > { %1093 = vmatmul.mubr.bf16.gmra.mrb[28].mxu1 %v2441_v58  ;;  %2240 = vmatprep.subr.bf16.mxu0 %v2646_v0  ;;  %v2445_v0 = vld [vmem:[%s2849_s17 + $0x8] ss:$16 sps:$4 sm:$0xff]  }
  0x6c   : > { %1291 = vmatpush1.bf16.msra.mxu1 %v2770_v20  ;;  %2032 = vmatprep.mubr.msk.bf16.mxu1 %vm724_vm0, %v2447_v59 }
  0x6d   : > { %1292 = vmatprep.subr.bf16.mxu1 %v2578_v1  ;;  %1246 = vmatmul.mubr.bf16.vlgmr.msra.gmra.mrb[32].mxu0 %v2442_v60 }
  0x6e   : > { %2241 = vmatpush3.bf16.msra.mxu0 %v2658_v3  ;;  %1253 = vmatprep.mubr.bf16.mxu0 %v2448_v61  ;;  %v2451_v3 = vld [vmem:[%s2849_s17 + $0x2c] ss:$16 sps:$4 sm:$0xff]  }
  0x6f   : > { %2242 = vmatprep.subr.bf16.mxu0 %v2664_v4  ;;  %v2456_v4 = vld [vmem:[%s2849_s17 + $0x40] ss:$16 sps:$4 sm:$0xff]  }
  0x70   : > { %1293 = vmatpush1.bf16.msra.mxu1 %v2797_v24 }
  0x71   : > { %1294 = vmatprep.subr.bf16.mxu1 %v2578_v1 }
  0x72   : > { %2243 = vmatpush3.bf16.msra.mxu0 %v2677_v6  ;;  %v2460_v6 = vld [vmem:[%s2849_s17 + $0x64] ss:$16 sps:$4 sm:$0xff]  }
  0x73   : > { %2244 = vmatprep.subr.bf16.mxu0 %v2682_v7  ;;  %v2453_v7 = vld [vmem:[%s2849_s17 + $0x28] ss:$16 sps:$4 sm:$0xff]  }
  0x74   : > { %1295 = vmatpush1.bf16.msra.mxu1 %v2814_v28 }
  0x75   : > { %1520 = vmatprep.subr.bf16.mxu1 %v2578_v1  ;;  %1254 = vmatmul.mubr.bf16.gmra.mrb[36].mxu0 %v2450_v62 }
  0x76   : > { %2245 = vmatpush3.bf16.msra.mxu0 %v2695_v9  ;;  %1261 = vmatprep.mubr.bf16.mxu0 %v2454_v63  ;;  %v2457_v9 = vld [vmem:[%s2849_s17 + $0x4c] ss:$16 sps:$4 sm:$0xff]  }
  0x77   : > { %1311 = vmatmul.mubr.bf16.vlgmr.msra.gmra.mrb[32].mxu1 %v2445_v0  ;;  %2246 = vmatprep.subr.bf16.mxu0 %v2704_v10  ;;  %v2459_v10 = vld [vmem:[%s2849_s17 + $0x48] ss:$16 sps:$4 sm:$0xff]  }
  0x78   : > { %1521 = vmatpush1.bf16.msra.mxu1 %v2652_v2  ;;  %2033 = vmatprep.mubr.msk.bf16.mxu1 %vm724_vm0, %v2451_v3  ;;  %v2462_v2 = vld [vmem:[%s2849_s17 + $0x60] ss:$16 sps:$4 sm:$0xff]  }
  0x79   : > { %1522 = vmatprep.subr.bf16.mxu1 %v2578_v1 }
  0x7a   : > { %2247 = vmatpush3.bf16.msra.mxu0 %v2718_v12  ;;  %v2463_v12 = vld [vmem:[%s2849_s17 + $0x6c] ss:$16 sps:$4 sm:$0xff]  }
  0x7b   : > { %2248 = vmatprep.subr.bf16.mxu0 %v2724_v13  ;;  %v2465_v13 = vld [vmem:[%s2849_s17 + $0x68] ss:$16 sps:$4 sm:$0xff]  }
  0x7c   : > { %1523 = vmatpush1.bf16.msra.mxu1 %v2671_v5  ;;  %v2468_v5 = vld [vmem:[%s2873_s20 + $0x4] ss:$16 sps:$4 sm:$0xff]  }
  0x7d   : > { %1524 = vmatprep.subr.bf16.mxu1 %v2578_v1  ;;  %1262 = vmatmul.mubr.bf16.gmra.mrb[40].mxu0 %v2456_v4 }
  0x7e   : > { %2249 = vmatpush3.bf16.msra.mxu0 %v2738_v15  ;;  %1269 = vmatprep.mubr.bf16.mxu0 %v2460_v6  ;;  %v2471_v15 = vld [vmem:[%s2873_s20 + $0xc] ss:$16 sps:$4 sm:$0xff]  }
  0x7f   : > { %1319 = vmatmul.mubr.bf16.gmra.mrb[36].mxu1 %v2453_v7  ;;  %2250 = vmatprep.subr.bf16.mxu0 %v2744_v16  ;;  %v2478_v16 = vld [vmem:[%s2873_s20 + $0x44] ss:$16 sps:$4 sm:$0xff]  }
  0x80   : > { %1525 = vmatpush1.bf16.msra.mxu1 %v2688_v8  ;;  %2034 = vmatprep.mubr.msk.bf16.mxu1 %vm724_vm0, %v2457_v9  ;;  %v2466_v8 = vld [vmem:[%s2873_s20] ss:$16 sps:$4 sm:$0xff]  }
  0x81   : > { %1526 = vmatprep.subr.bf16.mxu1 %v2578_v1 }
  0x82   : > { %2251 = vmatpush3.bf16.msra.mxu0 %v2759_v18  ;;  %v2475_v18 = vld [vmem:[%s2873_s20 + $0x2c] ss:$16 sps:$4 sm:$0xff]  }
  0x83   : > { %2252 = vmatprep.subr.bf16.mxu0 %v2765_v19  ;;  %v2480_v19 = vld [vmem:[%s2873_s20 + $0x40] ss:$16 sps:$4 sm:$0xff]  }
  0x84   : > { %1527 = vmatpush1.bf16.msra.mxu1 %v2710_v11  ;;  %v2472_v11 = vld [vmem:[%s2873_s20 + $0x24] ss:$16 sps:$4 sm:$0xff]  }
  0x85   : > { %1528 = vmatprep.subr.bf16.mxu1 %v2578_v1  ;;  %1270 = vmatmul.mubr.bf16.gmra.mrb[44].mxu0 %v2462_v2 }
  0x86   : > { %2253 = vmatpush3.bf16.msra.mxu0 %v2782_v21  ;;  %1487 = vmatprep.mubr.bf16.mxu0 %v2468_v5  ;;  %v2477_v21 = vld [vmem:[%s2873_s20 + $0x28] ss:$16 sps:$4 sm:$0xff]  }
  0x87   : > { %1327 = vmatmul.mubr.bf16.gmra.mrb[40].mxu1 %v2459_v10  ;;  %2254 = vmatprep.subr.bf16.mxu0 %v2789_v22  ;;  %v2481_v22 = vld [vmem:[%s2873_s20 + $0x4c] ss:$16 sps:$4 sm:$0xff]  }
  0x88   : > { %1529 = vmatpush1.bf16.msra.mxu1 %v2730_v14  ;;  %2035 = vmatprep.mubr.msk.bf16.mxu1 %vm724_vm0, %v2463_v12  ;;  %v2474_v14 = vld [vmem:[%s2873_s20 + $0x20] ss:$16 sps:$4 sm:$0xff]  }
  0x89   : > { %1530 = vmatprep.subr.bf16.mxu1 %v2578_v1 }
  0x8a   : > { %2255 = vmatpush3.bf16.msra.mxu0 %v2805_v26 }
  0x8c   : > { %1531 = vmatpush1.bf16.msra.mxu1 %v2750_v17  ;;  %v2469_v17 = vld [vmem:[%s2873_s20 + $0x8] ss:$16 sps:$4 sm:$0xff]  }
  0x8d   : > { %1532 = vmatprep.subr.bf16.mxu1 %v2578_v1  ;;  %1488 = vmatmul.mubr.bf16.vlgmr.msra.gmra.mrb[48].mxu0 %v2466_v8 }
  0x8e   : > { %1495 = vmatprep.mubr.bf16.mxu0 %v2472_v11 }
  0x8f   : > { %1335 = vmatmul.mubr.bf16.gmra.mrb[44].mxu1 %v2465_v13 }
  0x90   : > { %1533 = vmatpush1.bf16.msra.mxu1 %v2770_v20  ;;  %2052 = vmatprep.mubr.msk.bf16.mxu1 %vm724_vm0, %v2471_v15  ;;  %v2484_v20 = vld [vmem:[%s2873_s20 + $0x64] ss:$16 sps:$4 sm:$0xff]  }
  0x91   : > { %1534 = vmatprep.subr.bf16.mxu1 %v2578_v1 }
  0x94   : > { %1535 = vmatpush1.bf16.msra.mxu1 %v2797_v24  ;;  %v2487_v24 = vld [vmem:[%s2873_s20 + $0x6c] ss:$16 sps:$4 sm:$0xff]  }
  0x95   : > { %1536 = vmatprep.subr.bf16.mxu1 %v2578_v1  ;;  %1496 = vmatmul.mubr.bf16.gmra.mrb[52].mxu0 %v2474_v14  ;;  %v2483_v1 = vld [vmem:[%s2873_s20 + $0x48] ss:$16 sps:$4 sm:$0xff]  }
  0x96   : > { %1503 = vmatprep.mubr.bf16.mxu0 %v2478_v16 }
  0x98   : > { %1537 = vmatpush1.bf16.msra.mxu1 %v2814_v28 }
  0x9b   : > { %1553 = vmatmul.mubr.bf16.vlgmr.msra.gmra.mrb[48].mxu1 %v2469_v17 }
  0x9c   : > { %2053 = vmatprep.mubr.msk.bf16.mxu1 %vm724_vm0, %v2475_v18 }
  0x9d   : > { %1504 = vmatmul.mubr.bf16.gmra.mrb[56].mxu0 %v2480_v19 }
  0x9e   : > { %1511 = vmatprep.mubr.bf16.mxu0 %v2484_v20 }
  0xa3   : > { %1561 = vmatmul.mubr.bf16.gmra.mrb[52].mxu1 %v2477_v21 }
  0xa4   : > { %2054 = vmatprep.mubr.msk.bf16.mxu1 %vm724_vm0, %v2481_v22 }
  0xa5   : > { %1512 = vmatmul.mubr.bf16.gmra.mrb[60].mxu0 %v2486_v23 }
  0xab   : > { %1569 = vmatmul.mubr.bf16.gmra.mrb[56].mxu1 %v2483_v1 }
  0xac   : > { %2055 = vmatprep.mubr.msk.bf16.mxu1 %vm724_vm0, %v2487_v24 }
  0xb3   : > { %1577 = vmatmul.mubr.bf16.gmra.mrb[60].mxu1 %v2489_v25 }
  0xff   : > { %v2136_v26 = vpop.f32.mrb[0].mxu0 }
 0x100   : > { %v2137_v27 = vpop.f32.mrb[1].mxu0 }
 0x101   : > { %v2138_v28 = vadd.f32 %v2137_v27, %v2136_v26  ;;  %v2139_v29 = vpop.f32.mrb[2].mxu0 }
 0x102   : > { %v2140_v30 = vpop.f32.mrb[3].mxu0  ;;  %v836_v31 = vpop.f32.mrb[0].mxu1 }
 0x103   : > { %v2141_v32 = vadd.f32 %v2140_v30, %v2139_v29  ;;  %v3015_v33 = vadd.f32 %v2138_v28, %v836_v31  ;;  %v838_v34 = vpop.f32.mrb[1].mxu1 }
 0x104   : > { %v839_v35 = vpop.f32.mrb[2].mxu1 }
 0x105   : > { %v3017_v36 = vadd.f32 %v2141_v32, %v839_v35  ;;  %v841_v37 = vpop.f32.mrb[3].mxu1 }
 0x107   : > { %v2142_v38 = vpop.f32.mrb[4].mxu0 }
 0x108   : > { %v2143_v39 = vpop.f32.mrb[5].mxu0 }
 0x109   : > { %v2144_v40 = vadd.f32 %v2143_v39, %v2142_v38  ;;  %v2145_v41 = vpop.f32.mrb[6].mxu0 }
 0x10a   : > { %v844_v42 = vpop.f32.mrb[4].mxu1  ;;  %v2146_v43 = vpop.f32.mrb[7].mxu0 }
 0x10b   : > { %v3019_v44 = vadd.f32 %v2144_v40, %v844_v42  ;;  %v2147_v45 = vadd.f32 %v2146_v43, %v2145_v41  ;;  %v846_v46 = vpop.f32.mrb[5].mxu1 }
 0x10c   : > { %v847_v47 = vpop.f32.mrb[6].mxu1 }
 0x10d   : > { %v3021_v48 = vadd.f32 %v2147_v45, %v847_v47  ;;  %v849_v49 = vpop.f32.mrb[7].mxu1 }
 0x10f   : > { %v2148_v50 = vpop.f32.mrb[8].mxu0 }
 0x110   : > { %v2149_v51 = vpop.f32.mrb[9].mxu0 }
 0x111   : > { %v2150_v52 = vadd.f32 %v2149_v51, %v2148_v50  ;;  %v2151_v53 = vpop.f32.mrb[10].mxu0 }
 0x112   : > { %v852_v54 = vpop.f32.mrb[8].mxu1  ;;  %v2152_v55 = vpop.f32.mrb[11].mxu0 }
 0x113   : > { %v3023_v56 = vadd.f32 %v2150_v52, %v852_v54  ;;  %v2153_v57 = vadd.f32 %v2152_v55, %v2151_v53  ;;  %v854_v58 = vpop.f32.mrb[9].mxu1 }
 0x114   : > { %v855_v59 = vpop.f32.mrb[10].mxu1 }
 0x115   : > { %v3025_v60 = vadd.f32 %v2153_v57, %v855_v59  ;;  %v857_v61 = vpop.f32.mrb[11].mxu1 }
 0x117   : > { %v2154_v62 = vpop.f32.mrb[12].mxu0 }
 0x118   : > { %v2155_v63 = vpop.f32.mrb[13].mxu0 }
 0x119   : > { %v2156_v0 = vadd.f32 %v2155_v63, %v2154_v62  ;;  %v2157_v3 = vpop.f32.mrb[14].mxu0 }
 0x11a   : > { %v860_v4 = vpop.f32.mrb[12].mxu1  ;;  %v2158_v6 = vpop.f32.mrb[15].mxu0 }
 0x11b   : > { %v3027_v7 = vadd.f32 %v2156_v0, %v860_v4  ;;  %v2159_v9 = vadd.f32 %v2158_v6, %v2157_v3  ;;  %v862_v2 = vpop.f32.mrb[13].mxu1 }
 0x11c   : > { %v863_v5 = vpop.f32.mrb[14].mxu1 }
 0x11d   : > { %v3029_v10 = vadd.f32 %v2159_v9, %v863_v5  ;;  %v865_v12 = vpop.f32.mrb[15].mxu1 }
 0x11f   : > { %v2176_v8 = vpop.f32.mrb[16].mxu0 }
 0x120   : > { %v2177_v11 = vpop.f32.mrb[17].mxu0 }
 0x121   : > { %v2178_v13 = vadd.f32 %v2177_v11, %v2176_v8  ;;  %v2179_v15 = vpop.f32.mrb[18].mxu0 }
 0x122   : > { %v2180_v14 = vpop.f32.mrb[19].mxu0 }
 0x123   : > { %v2181_v16 = vadd.f32 %v2180_v14, %v2179_v15 }
 0x126   : > { %v1070_v17 = vpop.f32.mrb[16].mxu1 }
 0x127   : > { %v3031_v18 = vadd.f32 %v2178_v13, %v1070_v17  ;;  %v1072_v19 = vpop.f32.mrb[17].mxu1  ;;  %v2182_v20 = vpop.f32.mrb[20].mxu0 }
 0x128   : > { %v1073_v21 = vpop.f32.mrb[18].mxu1  ;;  %v2183_v22 = vpop.f32.mrb[21].mxu0 }
 0x129   : > { %v1101_v23 = vmax.f32 %v3015_v33, %v3031_v18  ;;  %v3035_v1 = vadd.f32 %v2181_v16, %v1073_v21  ;;  %v1075_v24 = vpop.f32.mrb[19].mxu1  ;;  %v2184_v25 = vadd.f32 %v2183_v22, %v2182_v20  ;;  %v2185_v26 = vpop.f32.mrb[22].mxu0 }
 0x12a   : > { %v2186_v27 = vpop.f32.mrb[23].mxu0 }
 0x12b   : > { %v1102_v28 = vmax.f32 %v3017_v36, %v3035_v1  ;;  %v2187_v29 = vadd.f32 %v2186_v27, %v2185_v26 }
 0x12e   : > { %v1078_v30 = vpop.f32.mrb[20].mxu1 }
 0x12f   : > { %v3039_v31 = vadd.f32 %v2184_v25, %v1078_v30  ;;  %v1080_v32 = vpop.f32.mrb[21].mxu1  ;;  %v2188_v34 = vpop.f32.mrb[24].mxu0 }
 0x130   : > { %v1081_v35 = vpop.f32.mrb[22].mxu1  ;;  %v2189_v37 = vpop.f32.mrb[25].mxu0 }
 0x131   : > { %v1103_v33 = vmax.f32 %v3019_v44, %v3039_v31  ;;  %v3043_v38 = vadd.f32 %v2187_v29, %v1081_v35  ;;  %v1083_v39 = vpop.f32.mrb[23].mxu1  ;;  %v2190_v40 = vadd.f32 %v2189_v37, %v2188_v34  ;;  %v2191_v41 = vpop.f32.mrb[26].mxu0 }
 0x132   : > { %v2192_v42 = vpop.f32.mrb[27].mxu0 }
 0x133   : > { %v1104_v36 = vmax.f32 %v3021_v48, %v3043_v38  ;;  %v2193_v43 = vadd.f32 %v2192_v42, %v2191_v41 }
 0x136   : > { %v1086_v45 = vpop.f32.mrb[24].mxu1 }
 0x137   : > { %v3047_v46 = vadd.f32 %v2190_v40, %v1086_v45  ;;  %v1088_v47 = vpop.f32.mrb[25].mxu1  ;;  %v2194_v49 = vpop.f32.mrb[28].mxu0 }
 0x138   : > { %v1089_v50 = vpop.f32.mrb[26].mxu1  ;;  %v2195_v51 = vpop.f32.mrb[29].mxu0 }
 0x139   : > { %v1105_v44 = vmax.f32 %v3023_v56, %v3047_v46  ;;  %v3051_v52 = vadd.f32 %v2193_v43, %v1089_v50  ;;  %v1091_v53 = vpop.f32.mrb[27].mxu1  ;;  %v2196_v54 = vadd.f32 %v2195_v51, %v2194_v49  ;;  %v2197_v55 = vpop.f32.mrb[30].mxu0 }
 0x13a   : > { %v2198_v57 = vpop.f32.mrb[31].mxu0 }
 0x13b   : > { %v1106_v48 = vmax.f32 %v3025_v60, %v3051_v52  ;;  %v2199_v58 = vadd.f32 %v2198_v57, %v2197_v55 }
 0x13e   : > { %v1094_v59 = vpop.f32.mrb[28].mxu1 }
 0x13f   : > { %v3055_v61 = vadd.f32 %v2196_v54, %v1094_v59  ;;  %v1096_v62 = vpop.f32.mrb[29].mxu1 }
 0x140   : > { %v1097_v63 = vpop.f32.mrb[30].mxu1  ;;  %v2216_v0 = vpop.f32.mrb[32].mxu0 }
 0x141   : > { %v1107_v3 = vmax.f32 %v3027_v7, %v3055_v61  ;;  %v3059_v56 = vadd.f32 %v2199_v58, %v1097_v63  ;;  %v1099_v4 = vpop.f32.mrb[31].mxu1  ;;  %v2217_v6 = vpop.f32.mrb[33].mxu0 }
 0x142   : > { %v2218_v9 = vadd.f32 %v2217_v6, %v2216_v0  ;;  %v2219_v2 = vpop.f32.mrb[34].mxu0 }
 0x143   : > { %v1108_v5 = vmax.f32 %v3029_v10, %v3059_v56  ;;  %v2220_v60 = vpop.f32.mrb[35].mxu0 }
 0x144   : > { %v2221_v12 = vadd.f32 %v2220_v60, %v2219_v2 }
 0x148   : > { %v2222_v8 = vpop.f32.mrb[36].mxu0 }
 0x149   : > { %v2223_v11 = vpop.f32.mrb[37].mxu0 }
 0x14a   : > { %v1312_v13 = vpop.f32.mrb[32].mxu1  ;;  %v2224_v15 = vadd.f32 %v2223_v11, %v2222_v8  ;;  %v2225_v14 = vpop.f32.mrb[38].mxu0 }
 0x14b   : > { %v1313_v16 = vadd.f32 %v2218_v9, %v1312_v13  ;;  %v1314_v17 = vpop.f32.mrb[33].mxu1  ;;  %v2226_v18 = vpop.f32.mrb[39].mxu0 }
 0x14c   : > { %v1315_v7 = vpop.f32.mrb[34].mxu1  ;;  %v2227_v19 = vadd.f32 %v2226_v18, %v2225_v14 }
 0x14d   : > { %v3063_v20 = vmax.f32 %v1101_v23, %v1313_v16  ;;  %v1316_v21 = vadd.f32 %v2221_v12, %v1315_v7  ;;  %v1317_v22 = vpop.f32.mrb[35].mxu1 }
 0x14f   : > { %v3065_v1 = vmax.f32 %v1102_v28, %v1316_v21 }
 0x150   : > { %v2228_v24 = vpop.f32.mrb[40].mxu0 }
 0x151   : > { %v2229_v10 = vpop.f32.mrb[41].mxu0 }
 0x152   : > { %v1320_v25 = vpop.f32.mrb[36].mxu1  ;;  %v2230_v26 = vadd.f32 %v2229_v10, %v2228_v24  ;;  %v2231_v27 = vpop.f32.mrb[42].mxu0 }
 0x153   : > { %v1321_v29 = vadd.f32 %v2224_v15, %v1320_v25  ;;  %v1322_v30 = vpop.f32.mrb[37].mxu1  ;;  %v2232_v31 = vpop.f32.mrb[43].mxu0  ;;  %v3082_v15 = vld [vmem:[%s3173_s5] ss:$0 sm:$0xff] }
 0x154   : > { %v1323_v32 = vpop.f32.mrb[38].mxu1  ;;  %v2233_v34 = vadd.f32 %v2232_v31, %v2231_v27 }
 0x155   : > { %v3067_v35 = vmax.f32 %v1103_v33, %v1321_v29  ;;  %v1324_v37 = vadd.f32 %v2227_v19, %v1323_v32  ;;  %v1325_v38 = vpop.f32.mrb[39].mxu1 }
 0x157   : > { %v3069_v23 = vmax.f32 %v1104_v36, %v1324_v37 }
 0x158   : > { %v2234_v39 = vpop.f32.mrb[44].mxu0 }
 0x159   : > { %v2235_v40 = vpop.f32.mrb[45].mxu0 }
 0x15a   : > { %v1328_v28 = vpop.f32.mrb[40].mxu1  ;;  %v2236_v41 = vadd.f32 %v2235_v40, %v2234_v39  ;;  %v2237_v42 = vpop.f32.mrb[46].mxu0 }
 0x15b   : > { %v1329_v43 = vadd.f32 %v2230_v26, %v1328_v28  ;;  %v1330_v45 = vpop.f32.mrb[41].mxu1  ;;  %v2238_v46 = vpop.f32.mrb[47].mxu0 }
 0x15c   : > { %v1331_v47 = vpop.f32.mrb[42].mxu1  ;;  %v2239_v49 = vadd.f32 %v2238_v46, %v2237_v42 }
 0x15d   : > { %v3071_v50 = vmax.f32 %v1105_v44, %v1329_v43  ;;  %v1332_v51 = vadd.f32 %v2233_v34, %v1331_v47  ;;  %v1333_v52 = vpop.f32.mrb[43].mxu1 }
 0x15f   : > { %v3073_v33 = vmax.f32 %v1106_v48, %v1332_v51 }
 0x160   : > { %v2256_v53 = vpop.f32.mrb[48].mxu0 }
 0x161   : > { %v2257_v54 = vpop.f32.mrb[49].mxu0 }
 0x162   : > { %v1336_v36 = vpop.f32.mrb[44].mxu1  ;;  %v2258_v55 = vadd.f32 %v2257_v54, %v2256_v53  ;;  %v2259_v57 = vpop.f32.mrb[50].mxu0 }
 0x163   : > { %v1337_v58 = vadd.f32 %v2236_v41, %v1336_v36  ;;  %v1338_v59 = vpop.f32.mrb[45].mxu1  ;;  %v2260_v61 = vpop.f32.mrb[51].mxu0 }
 0x164   : > { %v1339_v62 = vpop.f32.mrb[46].mxu1  ;;  %v2261_v63 = vadd.f32 %v2260_v61, %v2259_v57 }
 0x165   : > { %v3075_v0 = vmax.f32 %v1107_v3, %v1337_v58  ;;  %v1340_v56 = vadd.f32 %v2239_v49, %v1339_v62  ;;  %v1341_v4 = vpop.f32.mrb[47].mxu1 }
 0x167   : > { %v3077_v44 = vmax.f32 %v1108_v5, %v1340_v56 }
 0x168   : > { %v2262_v6 = vpop.f32.mrb[52].mxu0 }
 0x169   : > { %v2263_v48 = vpop.f32.mrb[53].mxu0 }
 0x16a   : > { %v2264_v9 = vadd.f32 %v2263_v48, %v2262_v6  ;;  %v2265_v2 = vpop.f32.mrb[54].mxu0 }
 0x16b   : > { %v2266_v60 = vpop.f32.mrb[55].mxu0 }
 0x16c   : > { %v2267_v12 = vadd.f32 %v2266_v60, %v2265_v2 }
 0x16e   : > { %v1554_v8 = vpop.f32.mrb[48].mxu1 }
 0x16f   : > { %v1555_v11 = vadd.f32 %v2258_v55, %v1554_v8  ;;  %v1556_v13 = vpop.f32.mrb[49].mxu1 }
 0x170   : > { %v1557_v3 = vpop.f32.mrb[50].mxu1  ;;  %v2268_v14 = vpop.f32.mrb[56].mxu0 }
 0x171   : > { %v1585_v5 = vmax.f32 %v3063_v20, %v1555_v11  ;;  %v1558_v16 = vadd.f32 %v2261_v63, %v1557_v3  ;;  %v1559_v17 = vpop.f32.mrb[51].mxu1  ;;  %v2269_v18 = vpop.f32.mrb[57].mxu0 }
 0x172   : > { %v2270_v7 = vadd.f32 %v2269_v18, %v2268_v14  ;;  %v2271_v19 = vpop.f32.mrb[58].mxu0 }
 0x173   : > { %v1600_v21 = vadd.f32 %v3082_v15, %v1585_v5  ;;  %v1586_v22 = vmax.f32 %v3065_v1, %v1558_v16  ;;  %v2272_v24 = vpop.f32.mrb[59].mxu0 }
 0x174   : > { %v2273_v10 = vadd.f32 %v2272_v24, %v2271_v19 }
 0x175   : > { %v1601_v25 = vadd.f32 %v3082_v15, %v1586_v22  ;;  %v1608_v27 = vmax.f32 %v1600_v21, 0.0 }
 0x176   : > { %v1562_v26 = vpop.f32.mrb[52].mxu1 }
 0x177   : > { %v1609_v29 = vmax.f32 %v1601_v25, 0.0  ;;  %v1563_v30 = vadd.f32 %v2264_v9, %v1562_v26  ;;  %v1564_v20 = vpop.f32.mrb[53].mxu1 }
 0x178   : > { %v1565_v31 = vpop.f32.mrb[54].mxu1  ;;  %v2274_v32 = vpop.f32.mrb[60].mxu0 }
 0x179   : > { %v2100_v34 = vpack.c.bf16 %v1609_v29, %v1608_v27  ;;  %v1587_v37 = vmax.f32 %v3067_v35, %v1563_v30  ;;  %v1566_v38 = vadd.f32 %v2267_v12, %v1565_v31  ;;  %v1567_v39 = vpop.f32.mrb[55].mxu1  ;;  %v2275_v40 = vpop.f32.mrb[61].mxu0 }
 0x17a   : > { %v2276_v28 = vadd.f32 %v2275_v40, %v2274_v32  ;;  %v2277_v1 = vpop.f32.mrb[62].mxu0 }
 0x17b   : > { %2101 = vst [vmem:[%s3090_s21] sm:$0xff] %v2100_v34   ;;  %v1602_v41 = vadd.f32 %v3082_v15, %v1587_v37  ;;  %v1588_v42 = vmax.f32 %v3069_v23, %v1566_v38  ;;  %v2278_v43 = vpop.f32.mrb[63].mxu0 }
 0x17c   : > { %v2279_v45 = vadd.f32 %v2278_v43, %v2277_v1 }
 0x17d   : > { %v1603_v46 = vadd.f32 %v3082_v15, %v1588_v42  ;;  %v1610_v35 = vmax.f32 %v1602_v41, 0.0 }
 0x17e   : > { %v1570_v47 = vpop.f32.mrb[56].mxu1 }
 0x17f   : > { %v1611_v49 = vmax.f32 %v1603_v46, 0.0  ;;  %v1571_v51 = vadd.f32 %v2270_v7, %v1570_v47  ;;  %v1572_v52 = vpop.f32.mrb[57].mxu1 }
 0x180   : > { %v1573_v53 = vpop.f32.mrb[58].mxu1 }
 0x181   : > { %v2105_v54 = vpack.c.bf16 %v1611_v49, %v1610_v35  ;;  %v1589_v36 = vmax.f32 %v3071_v50, %v1571_v51  ;;  %v1574_v55 = vadd.f32 %v2273_v10, %v1573_v53  ;;  %v1575_v57 = vpop.f32.mrb[59].mxu1 }
 0x183   : > { %2117 = vst [vmem:[%s3090_s21 + $0x8] sm:$0xff] %v2105_v54   ;;  %v1604_v58 = vadd.f32 %v3082_v15, %v1589_v36  ;;  %v1590_v23 = vmax.f32 %v3073_v33, %v1574_v55 }
 0x185   : > { %v1605_v59 = vadd.f32 %v3082_v15, %v1590_v23  ;;  %v1612_v62 = vmax.f32 %v1604_v58, 0.0 }
 0x186   : > { %v1578_v61 = vpop.f32.mrb[60].mxu1 }
 0x187   : > { %v1613_v63 = vmax.f32 %v1605_v59, 0.0  ;;  %v1579_v56 = vadd.f32 %v2276_v28, %v1578_v61  ;;  %v1580_v4 = vpop.f32.mrb[61].mxu1 }
 0x188   : > { %v1581_v6 = vpop.f32.mrb[62].mxu1 }
 0x189   : > { %v2110_v48 = vpack.c.bf16 %v1613_v63, %v1612_v62  ;;  %v1591_v50 = vmax.f32 %v3075_v0, %v1579_v56  ;;  %v1582_v9 = vadd.f32 %v2279_v45, %v1581_v6  ;;  %v1583_v2 = vpop.f32.mrb[63].mxu1 }
 0x18b   : > { %2118 = vst [vmem:[%s3090_s21 + $0x10] sm:$0xff] %v2110_v48   ;;  %v1606_v60 = vadd.f32 %v3082_v15, %v1591_v50  ;;  %v1592_v12 = vmax.f32 %v3077_v44, %v1582_v9 }
 0x18d   : > { %v1607_v33 = vadd.f32 %v3082_v15, %v1592_v12  ;;  %v1614_v8 = vmax.f32 %v1606_v60, 0.0  ;;  %1662 = sbr.rel (!%p2639_p4) target bundleno = 458 (0x1ca), region = 48 }
 0x18f   : > { %v1615_v11 = vmax.f32 %v1607_v33, 0.0 }
 0x191   : > { %v2115_v13 = vpack.c.bf16 %v1615_v11, %v1614_v8 }
 0x193   : > { %2119 = vst [vmem:[%s3090_s21 + $0x18] sm:$0xff] %v2115_v13  }
 0x194   : > { %s3183_s27 = smov (!%p1665_p8, %s1664_s27), 8 }
 0x195   : > { %s2067_s12 = sshll.u32 %s3183_s27, 6 }
 0x196   : > { %p2070_p9 = scmp.eq.s32.totalorder %s2067_s12, 0 }
 0x197   : > { %s3120_s13 = sshrl.u32 (!%p2070_p9), %s3183_s27, 3 }
 0x198   : > { %1673 = sbr.rel (%p2070_p9) target bundleno = 458 (0x1ca), region = 52  ;;  %p2071_p10 = scmp.le.s32.totalorder (!%p2070_p9), %s3120_s13, 0 }
 0x19f   : > { %1872 = sbr.rel (%p2071_p10) target bundleno = 437 (0x1b5), region = 133  ;;  %s3176_s24 = smov (!%p2071_p10), %s3114_s11 }
 0x1a0   : > { %s3177_s29 = smov (!%p2071_p10), %s3090_s21  ;;  %s3129_s30 = smov (!%p2071_p10), 0  }
 0x1a1   : > { %s3131_s14 = smov (!%p2071_p10), 0  }
 0x1a6 LB: >> { %v1689_v0 = vld [vmem:[%s2552_s29] sm:$0xf]  ;;  %v1691_v44 = vld [vmem:[%s2552_s29 + $0x4] sm:$0xf]  ;;  %v1693_v15 = vld [vmem:[%s2552_s29 + $0x8] sm:$0xf]  ;;  %s2560_s14 = sphi %s3131_s14, %s1683_s14   ;;  %s2556_s30 = sphi %s3129_s30, %s3178_s30   ;;  %s2552_s29 = sphi %s3177_s29, %s1710_s29   ;;  %s2548_s24 = sphi %s3176_s24, %s1711_s24  }
 0x1a7   : >> { %1690 = vst [vmem:[%s2548_s24] sm:$0xf] %v1689_v0  ;;  %1692 = vst [vmem:[%s2548_s24 + $0x4] sm:$0xf] %v1691_v44  ;;  %v1695_v3 = vld [vmem:[%s2552_s29 + $0xc] sm:$0xf]  ;;  %s1705_s15 = sadd.s32 1, %s2556_s30 }
 0x1a8   : >> { %1694 = vst [vmem:[%s2548_s24 + $0x8] sm:$0xf] %v1693_v15  ;;  %v1697_v14 = vld [vmem:[%s2552_s29 + $0x10] sm:$0xf]  ;;  %v1699_v5 = vld [vmem:[%s2552_s29 + $0x14] sm:$0xf]  ;;  %p1706_p11 = scmp.ge.s32.totalorder %s1705_s15, %s3120_s13 }
 0x1a9   : >> { %1696 = vst [vmem:[%s2548_s24 + $0xc] sm:$0xf] %v1695_v3  ;;  %1698 = vst [vmem:[%s2548_s24 + $0x10] sm:$0xf] %v1697_v14  ;;  %v1701_v16 = vld [vmem:[%s2552_s29 + $0x18] sm:$0xf] }
 0x1aa   : >> { %1700 = vst [vmem:[%s2548_s24 + $0x14] sm:$0xf] %v1699_v5  ;;  %v1703_v17 = vld [vmem:[%s2552_s29 + $0x1c] sm:$0xf]  ;;  %1702 = vst [vmem:[%s2548_s24 + $0x18] sm:$0xf] %v1701_v16 }
 0x1ab   : >> { %1704 = vst [vmem:[%s2548_s24 + $0x1c] sm:$0xf] %v1703_v17  ;;  %s3185_s15 = smov (%p1706_p11, %s1705_s15), 0  ;;  %s1683_s14 = sadd.s32 1, %s2560_s14  }
 0x1ac   : >> { %s2072_s17 = sshll.u32 %s3185_s15, 5  ;;  %p1682_p12 = scmp.ge.s32.totalorder %s1683_s14, %s3120_s13 }
 0x1ad   : >> { %s1710_s29 = scalar_lea.vmem %s3090_s21, %s2072_s17 [#allocation2]   ;;  %s1711_s24 = scalar_lea.vmem %s3114_s11, %s2072_s17  }
 0x1ae   : >> { %s3178_s30 = smov %s3185_s15  ;;  %1685 = sbr.rel (!%p1682_p12) target bundleno = 422 (0x1a6), region = 139 }
 0x1b5 PF: > { %s3150_s18 = sand.u32 7, %s3183_s27   ;;  %s2095_s19 = sshll.u32 %s3120_s13, 5 }
 0x1b6   : > { %s1716_s20 = scalar_lea.vmem %s3090_s21, %s2095_s19 [#allocation2]   ;;  %s1718_s7 = scalar_lea.vmem %s3114_s11, %s2095_s19  }
 0x1b7   : > { %p2077_p13 = scmp.le.s32.totalorder %s3150_s18, 0 }
 0x1b8   : > { %s2562_s16 = smov (!%p2077_p13), %s1718_s7   ;;  %s2566_s23 = smov (!%p2077_p13), %s1716_s20  }
 0x1b9   : > { %1886 = sbr.rel (%p2077_p13) target bundleno = 458 (0x1ca), region = 144  ;;  %s2570_s26 = smov (!%p2077_p13), 0  }
 0x1ba   : > { %s2574_s8 = smov (!%p2077_p13), 0  }
 0x1c0 LB: >> { %v1728_v18 = vld [vmem:[%s2568_s23] sm:$0xf]  ;;  %s1730_s27 = sadd.s32 1, %s2572_s26  ;;  %s1722_s8 = sadd.s32 1, %s2576_s8   ;;  %s2576_s8 = sphi %s2574_s8, %s1722_s8   ;;  %s2572_s26 = sphi %s2570_s26, %s2571_s26   ;;  %s2568_s23 = sphi %s2566_s23, %s1735_s23   ;;  %s2564_s16 = sphi %s2562_s16, %s1736_s16  }
 0x1c1   : >> { %1729 = vst [vmem:[%s2564_s16] sm:$0xf] %v1728_v18  ;;  %p1731_p0 = scmp.ge.s32.totalorder %s1730_s27, %s3150_s18  ;;  %p1721_p1 = scmp.ge.s32.totalorder %s1722_s8, %s3150_s18 }
 0x1c3   : >> { %s3187_s27 = smov (%p1731_p0, %s1730_s27), 0  ;;  %1724 = sbr.rel (!%p1721_p1) target bundleno = 448 (0x1c0), region = 150 }
 0x1c4   : >> { %s2078_s21 = sshll.u32 %s3187_s27, 2  ;;  %s2571_s26 = smov %s3187_s27  }
 0x1c5   : >> { %s1735_s23 = scalar_lea.vmem %s1716_s20, %s2078_s21 [#allocation2]   ;;  %s1736_s16 = scalar_lea.vmem %s1718_s7, %s2078_s21  }
 0x1ca PF: > { %p13_p2 = scmp.ge.s32.totalorder %s2629_s25, 4   ;;  %s3179_s21 = smov %s2540_s22 }
 0x1cb   : > { %s3180_s22 = smov %s2637_s28  ;;  %s3181_s23 = smov %s2629_s25 }
 0x1cc   :  { %15 = sbr.rel (!%p13_p2) target bundleno = 2 (0x2), region = 161 }

// kernel: cnn_forward.5
= control target key start
LH: loop header
LB: loop body
LE: loop exit
PB: predicated region body
PF: predicated region fallthrough
CT: control target
= control target key end

     0   :  { %vm1558_vm0 = vmmov 0   ;;  %vm885_vm1 = vcmask 261120   ;;  %s1921_s1 = inlined_call_operand.vmem [shape: bf16[1568,128], index: 1, kind: input, shape index: {}]   ;;  %s1922_s0 = inlined_call_operand.vmem [shape: bf16[16,1568], index: 0, kind: input, shape index: {}]   ;;  %s1923_s2 = inlined_call_operand.vmem [shape: f32[1,128], index: 2, kind: input, shape index: {}]   ;;  %s1924_s3 = inlined_call_operand.vmem [shape: f32[16,128], index: 3, kind: output, shape index: {}]  }
   0x1   :  { %v1440_v0 = vld [vmem:[%s1921_s1 + $0x40] sm:$0xff]   ;;  %v1444_v4 = vld [vmem:[%s1921_s1 + $0x48] sm:$0xff]   ;;  %v1448_v8 = vld [vmem:[%s1921_s1 + $0x50] sm:$0xff]  }
   0x2   :  { %v1441_v1 = vld [vmem:[%s1921_s1] sm:$0xff]   ;;  %1295 = vmatprep.subr.bf16.mxu0 %v1440_v0  ;;  %v1445_v5 = vld [vmem:[%s1921_s1 + $0x8] sm:$0xff]   ;;  %v1449_v9 = vld [vmem:[%s1921_s1 + $0x10] sm:$0xff]  }
   0x3   :  { %v1442_v2 = vld [vmem:[%s1921_s1 + $0xc0] sm:$0xff]   ;;  %1296 = vmatpush3.bf16.msra.mxu0 %v1441_v1  ;;  %v1446_v6 = vld [vmem:[%s1921_s1 + $0xc8] sm:$0xff]   ;;  %v1450_v10 = vld [vmem:[%s1921_s1 + $0xd0] sm:$0xff]  }
   0x4   :  { %v1443_v3 = vld [vmem:[%s1921_s1 + $0x80] sm:$0xff]   ;;  %1317 = vmatprep.subr.bf16.mxu1 %v1442_v2  ;;  %1297 = vmatprep.subr.bf16.mxu0 %v1444_v4  ;;  %v1447_v7 = vld [vmem:[%s1921_s1 + $0x88] sm:$0xff]   ;;  %v1451_v11 = vld [vmem:[%s1921_s1 + $0x90] sm:$0xff]  }
   0x5   :  { %1318 = vmatpush3.bf16.msra.mxu1 %v1443_v3  ;;  %v1452_v12 = vld [vmem:[%s1921_s1 + $0x58] sm:$0xff]   ;;  %v1456_v16 = vld [vmem:[%s1921_s1 + $0x60] sm:$0xff]   ;;  %v1460_v20 = vld [vmem:[%s1921_s1 + $0x68] sm:$0xff]  }
   0x6   :  { %1319 = vmatprep.subr.bf16.mxu1 %v1446_v6  ;;  %v1453_v13 = vld [vmem:[%s1921_s1 + $0x18] sm:$0xff]   ;;  %v1457_v17 = vld [vmem:[%s1921_s1 + $0x20] sm:$0xff]   ;;  %v1461_v21 = vld [vmem:[%s1921_s1 + $0x28] sm:$0xff]  }
   0x7   :  { %1298 = vmatpush3.bf16.msra.mxu0 %v1445_v5  ;;  %v1454_v14 = vld [vmem:[%s1921_s1 + $0xd8] sm:$0xff]   ;;  %v1458_v18 = vld [vmem:[%s1921_s1 + $0xe0] sm:$0xff]   ;;  %v1462_v22 = vld [vmem:[%s1921_s1 + $0xe8] sm:$0xff]  }
   0x8   :  { %1299 = vmatprep.subr.bf16.mxu0 %v1448_v8  ;;  %v1455_v15 = vld [vmem:[%s1921_s1 + $0x98] sm:$0xff]   ;;  %v1459_v19 = vld [vmem:[%s1921_s1 + $0xa0] sm:$0xff]   ;;  %v1463_v23 = vld [vmem:[%s1921_s1 + $0xa8] sm:$0xff]  }
   0x9   :  { %1320 = vmatpush3.bf16.msra.mxu1 %v1447_v7  ;;  %v1464_v24 = vld [vmem:[%s1921_s1 + $0x70] sm:$0xff]   ;;  %v1468_v28 = vld [vmem:[%s1921_s1 + $0x78] sm:$0xff]   ;;  %v1475_v34 = vld [vmem:[%s1921_s1 + $0x140] sm:$0xff]  }
   0xa   :  { %1321 = vmatprep.subr.bf16.mxu1 %v1450_v10  ;;  %v1465_v25 = vld [vmem:[%s1921_s1 + $0x30] sm:$0xff]   ;;  %v1469_v29 = vld [vmem:[%s1921_s1 + $0x38] sm:$0xff]   ;;  %v1478_v36 = vld [vmem:[%s1922_s0 + $0xc] ss:$52 sps:$4 sm:$0xff]  }
   0xb   :  { %1300 = vmatpush3.bf16.msra.mxu0 %v1449_v9  ;;  %v1466_v26 = vld [vmem:[%s1921_s1 + $0xf0] sm:$0xff]   ;;  %v1470_v30 = vld [vmem:[%s1921_s1 + $0xf8] sm:$0xff]   ;;  %v1479_v37 = vld [vmem:[%s1921_s1 + $0x100] sm:$0xff]   ;;  %962 = vmatprep.mubr.bf16.mxu1 %v1478_v36 }
   0xc   :  { %1301 = vmatprep.subr.bf16.mxu0 %v1452_v12  ;;  %v1467_v27 = vld [vmem:[%s1921_s1 + $0xb0] sm:$0xff]   ;;  %v1471_v31 = vld [vmem:[%s1921_s1 + $0xb8] sm:$0xff]   ;;  %v1480_v38 = vld [vmem:[%s1921_s1 + $0x1c0] sm:$0xff]  }
   0xd   :  { %1322 = vmatpush3.bf16.msra.mxu1 %v1451_v11  ;;  %v1472_v32 = vld [vmem:[%s1922_s0] ss:$52 sps:$4 sm:$0xff]   ;;  %v1474_v33 = vld [vmem:[%s1922_s0 + $0x4] ss:$52 sps:$4 sm:$0xff]   ;;  %v1476_v35 = vld [vmem:[%s1922_s0 + $0x8] ss:$52 sps:$4 sm:$0xff]  }
   0xe   :  { %1323 = vmatprep.subr.bf16.mxu1 %v1454_v14  ;;  %921 = vmatprep.mubr.bf16.mxu0 %v1474_v33  ;;  %v1481_v39 = vld [vmem:[%s1921_s1 + $0x180] sm:$0xff]   ;;  %v1482_v40 = vld [vmem:[%s1921_s1 + $0x148] sm:$0xff]   ;;  %v1486_v44 = vld [vmem:[%s1921_s1 + $0x150] sm:$0xff]  }
   0xf   :  { %1302 = vmatpush3.bf16.msra.mxu0 %v1453_v13  ;;  %v1483_v41 = vld [vmem:[%s1921_s1 + $0x108] sm:$0xff]   ;;  %v1487_v45 = vld [vmem:[%s1921_s1 + $0x110] sm:$0xff]   ;;  %v1490_v48 = vld [vmem:[%s1921_s1 + $0x158] sm:$0xff]  }
  0x10   :  { %1303 = vmatprep.subr.bf16.mxu0 %v1456_v16  ;;  %v1484_v42 = vld [vmem:[%s1921_s1 + $0x1c8] sm:$0xff]   ;;  %v1488_v46 = vld [vmem:[%s1921_s1 + $0x1d0] sm:$0xff]   ;;  %v1491_v49 = vld [vmem:[%s1921_s1 + $0x118] sm:$0xff]  }
  0x11   :  { %1324 = vmatpush3.bf16.msra.mxu1 %v1455_v15  ;;  %v1485_v43 = vld [vmem:[%s1921_s1 + $0x188] sm:$0xff]   ;;  %v1489_v47 = vld [vmem:[%s1921_s1 + $0x190] sm:$0xff]   ;;  %v1492_v50 = vld [vmem:[%s1921_s1 + $0x1d8] sm:$0xff]  }
  0x12   :  { %1325 = vmatprep.subr.bf16.mxu1 %v1458_v18  ;;  %v1493_v51 = vld [vmem:[%s1921_s1 + $0x198] sm:$0xff]   ;;  %v1494_v52 = vld [vmem:[%s1921_s1 + $0x160] sm:$0xff]   ;;  %v1498_v56 = vld [vmem:[%s1921_s1 + $0x168] sm:$0xff]  }
  0x13   :  { %1304 = vmatpush3.bf16.msra.mxu0 %v1457_v17  ;;  %v1495_v53 = vld [vmem:[%s1921_s1 + $0x120] sm:$0xff]   ;;  %v1499_v57 = vld [vmem:[%s1921_s1 + $0x128] sm:$0xff]   ;;  %v1502_v60 = vld [vmem:[%s1921_s1 + $0x170] sm:$0xff]  }
  0x14   :  { %1305 = vmatprep.subr.bf16.mxu0 %v1460_v20  ;;  %v1496_v54 = vld [vmem:[%s1921_s1 + $0x1e0] sm:$0xff]   ;;  %v1500_v58 = vld [vmem:[%s1921_s1 + $0x1e8] sm:$0xff]   ;;  %v1503_v61 = vld [vmem:[%s1921_s1 + $0x130] sm:$0xff]  }
  0x15   :  { %1326 = vmatpush3.bf16.msra.mxu1 %v1459_v19  ;;  %v1497_v55 = vld [vmem:[%s1921_s1 + $0x1a0] sm:$0xff]   ;;  %v1501_v59 = vld [vmem:[%s1921_s1 + $0x1a8] sm:$0xff]   ;;  %v1504_v62 = vld [vmem:[%s1921_s1 + $0x1f0] sm:$0xff]  }
  0x16   :  { %1327 = vmatprep.subr.bf16.mxu1 %v1462_v22  ;;  %v1505_v63 = vld [vmem:[%s1921_s1 + $0x1b0] sm:$0xff]   ;;  %v1506_v0 = vld [vmem:[%s1921_s1 + $0x178] sm:$0xff]   ;;  %v1513_v6 = vld [vmem:[%s1921_s1 + $0x240] sm:$0xff]  }
  0x17   :  { %1306 = vmatpush3.bf16.msra.mxu0 %v1461_v21  ;;  %v1507_v1 = vld [vmem:[%s1921_s1 + $0x138] sm:$0xff]   ;;  %v1510_v4 = vld [vmem:[%s1922_s0 + $0x10] ss:$52 sps:$4 sm:$0xff]   ;;  %v1512_v5 = vld [vmem:[%s1922_s0 + $0x14] ss:$52 sps:$4 sm:$0xff]  }
  0x18   :  { %1307 = vmatprep.subr.bf16.mxu0 %v1464_v24  ;;  %v1508_v2 = vld [vmem:[%s1921_s1 + $0x1f8] sm:$0xff]   ;;  %v1517_v9 = vld [vmem:[%s1921_s1 + $0x200] sm:$0xff]   ;;  %v1520_v12 = vld [vmem:[%s1921_s1 + $0x248] sm:$0xff]  }
  0x19   :  { %1328 = vmatpush3.bf16.msra.mxu1 %v1463_v23  ;;  %v1509_v3 = vld [vmem:[%s1921_s1 + $0x1b8] sm:$0xff]   ;;  %v1518_v10 = vld [vmem:[%s1921_s1 + $0x2c0] sm:$0xff]   ;;  %v1521_v13 = vld [vmem:[%s1921_s1 + $0x208] sm:$0xff]  }
  0x1a   :  { %1329 = vmatprep.subr.bf16.mxu1 %v1466_v26  ;;  %v1514_v7 = vld [vmem:[%s1922_s0 + $0x18] ss:$52 sps:$4 sm:$0xff]   ;;  %v1516_v8 = vld [vmem:[%s1922_s0 + $0x1c] ss:$52 sps:$4 sm:$0xff]   ;;  %v1519_v11 = vld [vmem:[%s1921_s1 + $0x280] sm:$0xff]  }
  0x1b   :  { %1308 = vmatpush3.bf16.msra.mxu0 %v1465_v25  ;;  %v1522_v14 = vld [vmem:[%s1921_s1 + $0x2c8] sm:$0xff]   ;;  %v1524_v16 = vld [vmem:[%s1921_s1 + $0x250] sm:$0xff]   ;;  %v1528_v20 = vld [vmem:[%s1921_s1 + $0x258] sm:$0xff]  }
  0x1c   :  { %1309 = vmatprep.subr.bf16.mxu0 %v1468_v28  ;;  %v1523_v15 = vld [vmem:[%s1921_s1 + $0x288] sm:$0xff]   ;;  %v1525_v17 = vld [vmem:[%s1921_s1 + $0x210] sm:$0xff]   ;;  %v1529_v21 = vld [vmem:[%s1921_s1 + $0x218] sm:$0xff]  }
  0x1d   :  { %1330 = vmatpush3.bf16.msra.mxu1 %v1467_v27  ;;  %v1526_v18 = vld [vmem:[%s1921_s1 + $0x2d0] sm:$0xff]   ;;  %v1530_v22 = vld [vmem:[%s1921_s1 + $0x2d8] sm:$0xff]   ;;  %v1532_v24 = vld [vmem:[%s1921_s1 + $0x260] sm:$0xff]  }
  0x1e   :  { %1331 = vmatprep.subr.bf16.mxu1 %v1470_v30  ;;  %v1527_v19 = vld [vmem:[%s1921_s1 + $0x290] sm:$0xff]   ;;  %v1531_v23 = vld [vmem:[%s1921_s1 + $0x298] sm:$0xff]   ;;  %v1533_v25 = vld [vmem:[%s1921_s1 + $0x220] sm:$0xff]  }
  0x1f   :  { %1310 = vmatpush3.bf16.msra.mxu0 %v1469_v29  ;;  %v1534_v26 = vld [vmem:[%s1921_s1 + $0x2e0] sm:$0xff]   ;;  %v1536_v28 = vld [vmem:[%s1921_s1 + $0x268] sm:$0xff]   ;;  %v1541_v33 = vld [vmem:[%s1921_s1 + $0x230] sm:$0xff]  }
  0x20   :  { %1339 = vmatprep.subr.bf16.mxu0 %v1475_v34  ;;  %v1535_v27 = vld [vmem:[%s1921_s1 + $0x2a0] sm:$0xff]   ;;  %v1537_v29 = vld [vmem:[%s1921_s1 + $0x228] sm:$0xff]   ;;  %v1542_v34 = vld [vmem:[%s1921_s1 + $0x2f0] sm:$0xff]  }
  0x21   :  { %1332 = vmatpush3.bf16.msra.mxu1 %v1471_v31  ;;  %v1538_v30 = vld [vmem:[%s1921_s1 + $0x2e8] sm:$0xff]   ;;  %v1544_v36 = vld [vmem:[%s1921_s1 + $0x278] sm:$0xff]  }
  0x22   :  { %922 = vmatmul.mubr.bf16.vlgmr.msra.gmra.mrb[0].mxu0 %v1472_v32  ;;  %1361 = vmatprep.subr.bf16.mxu1 %v1480_v38  ;;  %v1539_v31 = vld [vmem:[%s1921_s1 + $0x2a8] sm:$0xff]   ;;  %v1540_v32 = vld [vmem:[%s1921_s1 + $0x270] sm:$0xff]   ;;  %v1546_v38 = vld [vmem:[%s1921_s1 + $0x2f8] sm:$0xff]  }
  0x23   :  { %1340 = vmatpush3.bf16.msra.mxu0 %v1479_v37  ;;  %1003 = vmatprep.mubr.bf16.mxu0 %v1512_v5  ;;  %v1545_v37 = vld [vmem:[%s1921_s1 + $0x238] sm:$0xff]  }
  0x24   :  { %963 = vmatmul.mubr.bf16.vlgmr.msra.gmra.mrb[0].mxu1 %v1476_v35  ;;  %1341 = vmatprep.subr.bf16.mxu0 %v1482_v40  ;;  %v1543_v35 = vld [vmem:[%s1921_s1 + $0x2b0] sm:$0xff]  }
  0x25   :  { %1362 = vmatpush3.bf16.msra.mxu1 %v1481_v39  ;;  %1044 = vmatprep.mubr.bf16.mxu1 %v1516_v8  ;;  %v1547_v39 = vld [vmem:[%s1921_s1 + $0x2b8] sm:$0xff]   ;;  %v1548_v40 = vld [vmem:[%s1922_s0 + $0x20] ss:$52 sps:$4 sm:$0xff]  }
  0x26   :  { %1363 = vmatprep.subr.bf16.mxu1 %v1484_v42  ;;  %v1557_v42 = vmov 0.0  }
  0x27   :  { %1342 = vmatpush3.bf16.msra.mxu0 %v1483_v41  ;;  %v1550_v41 = vld [vmem:[%s1922_s0 + $0x24] ss:$52 sps:$4 sm:$0xff]  }
  0x28   :  { %1343 = vmatprep.subr.bf16.mxu0 %v1486_v44  ;;  %v1553_v44 = vld [vmem:[%s1922_s0 + $0x2c] ss:$52 sps:$4 sm:$0xff]  }
  0x29   :  { %1364 = vmatpush3.bf16.msra.mxu1 %v1485_v43  ;;  %v1551_v43 = vld [vmem:[%s1922_s0 + $0x28] ss:$52 sps:$4 sm:$0xff]  }
  0x2a   :  { %1365 = vmatprep.subr.bf16.mxu1 %v1488_v46  ;;  %v1555_v46 = vld [vmem:[%s1921_s1 + $0x308] sm:$0xff]  }
  0x2b   :  { %1344 = vmatpush3.bf16.msra.mxu0 %v1487_v45  ;;  %v1554_v45 = vld [vmem:[%s1921_s1 + $0x300] sm:$0xff]  }
  0x2c   :  { %1345 = vmatprep.subr.bf16.mxu0 %v1490_v48 }
  0x2d   :  { %1366 = vmatpush3.bf16.msra.mxu1 %v1489_v47  ;;  %v1556_v47 = vld [vmem:[%s1922_s0 + $0x30] ss:$52 sps:$4 sm:$0xff]  }
  0x2e   :  { %1367 = vmatprep.subr.bf16.mxu1 %v1492_v50 }
  0x2f   :  { %1346 = vmatpush3.bf16.msra.mxu0 %v1491_v49  ;;  %v1182_v49 = vld [vmem:[%s1923_s2] ss:$0 sm:$0xff] }
  0x30   :  { %1347 = vmatprep.subr.bf16.mxu0 %v1494_v52 }
  0x31   :  { %1368 = vmatpush3.bf16.msra.mxu1 %v1493_v51 }
  0x32   :  { %1369 = vmatprep.subr.bf16.mxu1 %v1496_v54 }
  0x33   :  { %1348 = vmatpush3.bf16.msra.mxu0 %v1495_v53 }
  0x34   :  { %1349 = vmatprep.subr.bf16.mxu0 %v1498_v56 }
  0x35   :  { %1370 = vmatpush3.bf16.msra.mxu1 %v1497_v55 }
  0x36   :  { %1371 = vmatprep.subr.bf16.mxu1 %v1500_v58 }
  0x37   :  { %1350 = vmatpush3.bf16.msra.mxu0 %v1499_v57 }
  0x38   :  { %1351 = vmatprep.subr.bf16.mxu0 %v1502_v60 }
  0x39   :  { %1372 = vmatpush3.bf16.msra.mxu1 %v1501_v59 }
  0x3a   :  { %1373 = vmatprep.subr.bf16.mxu1 %v1504_v62 }
  0x3b   :  { %1352 = vmatpush3.bf16.msra.mxu0 %v1503_v61 }
  0x3c   :  { %1353 = vmatprep.subr.bf16.mxu0 %v1506_v0 }
  0x3d   :  { %1374 = vmatpush3.bf16.msra.mxu1 %v1505_v63 }
  0x3e   :  { %1375 = vmatprep.subr.bf16.mxu1 %v1508_v2 }
  0x3f   :  { %1354 = vmatpush3.bf16.msra.mxu0 %v1507_v1 }
  0x40   :  { %1383 = vmatprep.subr.bf16.mxu0 %v1513_v6 }
  0x41   :  { %1376 = vmatpush3.bf16.msra.mxu1 %v1509_v3 }
  0x42   :  { %1004 = vmatmul.mubr.bf16.vlgmr.msra.gmra.mrb[4].mxu0 %v1510_v4  ;;  %1405 = vmatprep.subr.bf16.mxu1 %v1518_v10 }
  0x43   :  { %1384 = vmatpush3.bf16.msra.mxu0 %v1517_v9  ;;  %1085 = vmatprep.mubr.bf16.mxu0 %v1550_v41 }
  0x44   :  { %1045 = vmatmul.mubr.bf16.vlgmr.msra.gmra.mrb[4].mxu1 %v1514_v7  ;;  %1385 = vmatprep.subr.bf16.mxu0 %v1520_v12 }
  0x45   :  { %1406 = vmatpush3.bf16.msra.mxu1 %v1519_v11  ;;  %1126 = vmatprep.mubr.bf16.mxu1 %v1553_v44 }
  0x46   :  { %1407 = vmatprep.subr.bf16.mxu1 %v1522_v14 }
  0x47   :  { %1386 = vmatpush3.bf16.msra.mxu0 %v1521_v13 }
  0x48   :  { %1387 = vmatprep.subr.bf16.mxu0 %v1524_v16 }
  0x49   :  { %1408 = vmatpush3.bf16.msra.mxu1 %v1523_v15 }
  0x4a   :  { %1409 = vmatprep.subr.bf16.mxu1 %v1526_v18 }
  0x4b   :  { %1388 = vmatpush3.bf16.msra.mxu0 %v1525_v17 }
  0x4c   :  { %1389 = vmatprep.subr.bf16.mxu0 %v1528_v20 }
  0x4d   :  { %1410 = vmatpush3.bf16.msra.mxu1 %v1527_v19 }
  0x4e   :  { %1411 = vmatprep.subr.bf16.mxu1 %v1530_v22 }
  0x4f   :  { %1390 = vmatpush3.bf16.msra.mxu0 %v1529_v21 }
  0x50   :  { %1391 = vmatprep.subr.bf16.mxu0 %v1532_v24 }
  0x51   :  { %1412 = vmatpush3.bf16.msra.mxu1 %v1531_v23 }
  0x52   :  { %1413 = vmatprep.subr.bf16.mxu1 %v1534_v26 }
  0x53   :  { %1392 = vmatpush3.bf16.msra.mxu0 %v1533_v25 }
  0x54   :  { %1393 = vmatprep.subr.bf16.mxu0 %v1536_v28 }
  0x55   :  { %1414 = vmatpush3.bf16.msra.mxu1 %v1535_v27 }
  0x56   :  { %1415 = vmatprep.subr.bf16.mxu1 %v1538_v30 }
  0x57   :  { %1394 = vmatpush3.bf16.msra.mxu0 %v1537_v29 }
  0x58   :  { %1395 = vmatprep.subr.bf16.mxu0 %v1540_v32 }
  0x59   :  { %1416 = vmatpush3.bf16.msra.mxu1 %v1539_v31 }
  0x5a   :  { %1417 = vmatprep.subr.bf16.mxu1 %v1542_v34 }
  0x5b   :  { %1396 = vmatpush3.bf16.msra.mxu0 %v1541_v33 }
  0x5c   :  { %1397 = vmatprep.subr.bf16.mxu0 %v1544_v36 }
  0x5d   :  { %1418 = vmatpush3.bf16.msra.mxu1 %v1543_v35 }
  0x5e   :  { %1419 = vmatprep.subr.bf16.mxu1 %v1546_v38 }
  0x5f   :  { %1398 = vmatpush3.bf16.msra.mxu0 %v1545_v37 }
  0x60   :  { %1430 = vmatprep.subr.bf16.mxu0 %v1557_v42 }
  0x61   :  { %1420 = vmatpush3.bf16.msra.mxu1 %v1547_v39 }
  0x62   :  { %1086 = vmatmul.mubr.bf16.vlgmr.msra.gmra.mrb[8].mxu0 %v1548_v40 }
  0x63   :  { %1431 = vmatpush3.bf16.msra.mxu0 %v1554_v45  ;;  %1434 = vmatprep.mubr.msk.bf16.mxu0 %vm1558_vm0, %v1557_v42 }
  0x64   :  { %1127 = vmatmul.mubr.bf16.vlgmr.msra.gmra.mrb[8].mxu1 %v1551_v43  ;;  %1432 = vmatprep.subr.bf16.mxu0 %v1557_v42 }
  0x67   :  { %1433 = vmatpush3.bf16.msra.mxu0 %v1555_v46 }
  0x6a   :  { %1435 = vmatmul.mubr.msk.bf16.vlgmr.msra.gmra.mrb[12].mxu0 %vm885_vm1, %v1556_v47 }
  0xf5   :  { %v1311_v48 = vpop.f32.mrb[0].mxu0 }
  0xf6   :  { %v1312_v50 = vpop.f32.mrb[1].mxu0 }
  0xf7   :  { %v1313_v51 = vadd.f32 %v1312_v50, %v1311_v48  ;;  %v1314_v52 = vpop.f32.mrb[2].mxu0  ;;  %v1333_v53 = vpop.f32.mrb[0].mxu1 }
  0xf8   :  { %v1315_v54 = vpop.f32.mrb[3].mxu0  ;;  %v1334_v55 = vpop.f32.mrb[1].mxu1 }
  0xf9   :  { %v924_v56 = vadd.f32 %v1313_v51, %v1182_v49  ;;  %v1316_v57 = vadd.f32 %v1315_v54, %v1314_v52  ;;  %v1335_v58 = vadd.f32 %v1334_v55, %v1333_v53  ;;  %v1336_v59 = vpop.f32.mrb[2].mxu1 }
  0xfa   :  { %v1337_v60 = vpop.f32.mrb[3].mxu1 }
  0xfb   :  { %v927_v61 = vadd.f32 %v1316_v57, %v1182_v49  ;;  %v965_v62 = vadd.f32 %v1335_v58, %v924_v56  ;;  %v1338_v63 = vadd.f32 %v1337_v60, %v1336_v59 }
  0xfd   :  { %v968_v0 = vadd.f32 %v1338_v63, %v927_v61 }
 0x115   :  { %v1355_v1 = vpop.f32.mrb[4].mxu0 }
 0x116   :  { %v1356_v2 = vpop.f32.mrb[5].mxu0 }
 0x117   :  { %v1357_v3 = vadd.f32 %v1356_v2, %v1355_v1  ;;  %v1358_v4 = vpop.f32.mrb[6].mxu0  ;;  %v1377_v5 = vpop.f32.mrb[4].mxu1 }
 0x118   :  { %v1359_v6 = vpop.f32.mrb[7].mxu0  ;;  %v1378_v9 = vpop.f32.mrb[5].mxu1 }
 0x119   :  { %v1006_v7 = vadd.f32 %v1357_v3, %v965_v62  ;;  %v1360_v8 = vadd.f32 %v1359_v6, %v1358_v4  ;;  %v1379_v10 = vadd.f32 %v1378_v9, %v1377_v5  ;;  %v1380_v11 = vpop.f32.mrb[6].mxu1 }
 0x11a   :  { %v1381_v13 = vpop.f32.mrb[7].mxu1 }
 0x11b   :  { %v1009_v12 = vadd.f32 %v1360_v8, %v968_v0  ;;  %v1047_v14 = vadd.f32 %v1379_v10, %v1006_v7  ;;  %v1382_v15 = vadd.f32 %v1381_v13, %v1380_v11 }
 0x11d   :  { %v1050_v16 = vadd.f32 %v1382_v15, %v1009_v12 }
 0x135   :  { %v1399_v17 = vpop.f32.mrb[8].mxu0 }
 0x136   :  { %v1400_v18 = vpop.f32.mrb[9].mxu0 }
 0x137   :  { %v1421_v19 = vpop.f32.mrb[8].mxu1  ;;  %v1401_v20 = vadd.f32 %v1400_v18, %v1399_v17  ;;  %v1402_v21 = vpop.f32.mrb[10].mxu0 }
 0x138   :  { %v1422_v22 = vpop.f32.mrb[9].mxu1  ;;  %v1403_v24 = vpop.f32.mrb[11].mxu0 }
 0x139   :  { %v1423_v23 = vadd.f32 %v1422_v22, %v1421_v19  ;;  %v1424_v25 = vpop.f32.mrb[10].mxu1  ;;  %v1088_v26 = vadd.f32 %v1401_v20, %v1047_v14  ;;  %v1404_v27 = vadd.f32 %v1403_v24, %v1402_v21 }
 0x13a   :  { %v1425_v28 = vpop.f32.mrb[11].mxu1 }
 0x13b   :  { %v1426_v29 = vadd.f32 %v1425_v28, %v1424_v25  ;;  %v1091_v30 = vadd.f32 %v1404_v27, %v1050_v16  ;;  %v1129_v31 = vadd.f32 %v1423_v23, %v1088_v26 }
 0x13d   :  { %v1169_v32 = vpop.f32.mrb[12].mxu0  ;;  %v1132_v33 = vadd.f32 %v1426_v29, %v1091_v30 }
 0x13e   :  { %v1170_v34 = vadd.f32 %v1169_v32, %v1129_v31  ;;  %v1436_v35 = vpop.f32.mrb[13].mxu0 }
 0x13f   :  { %v1172_v36 = vpop.f32.mrb[14].mxu0 }
 0x140   :  { %1176 = vst [vmem:[%s1924_s3] sm:$0xff] %v1170_v34  ;;  %v1173_v37 = vadd.f32 %v1172_v36, %v1132_v33  ;;  %v1437_v38 = vpop.f32.mrb[15].mxu0 }
 0x142   :  { %1177 = vst [vmem:[%s1924_s3 + $0x8] sm:$0xff] %v1173_v37 }

</bundles_post_ra>
